<compile_context>
chip_gen: v7x
topology: tpu7x:2x2x1
jax: 0.10.0
libtpu: 0.0.40
codegen_flags: <defaults>
</compile_context>

<pallas_src>
import functools

import jax
import jax.numpy as jnp
from jax import lax
from jax.experimental import pallas as pl
from jax.experimental.pallas import tpu as pltpu


LN_EPS = 1e-5  # PyTorch nn.LayerNorm default


def _round_up(x, m):
    return (x + m - 1) // m * m


def _layernorm_rows(z, gamma, beta, rmask, inv_n, eps):
    """LayerNorm over the sublane (sequence) axis; stats restricted to valid rows.

    z: [Lp, N], gamma/beta: [Lp, 1], rmask: [Lp, 1] float mask or None.
    """
    zm = z if rmask is None else z * rmask
    mean = jnp.sum(zm, axis=0, keepdims=True) * inv_n            # [1, N]
    diff = z - mean
    diff_m = diff if rmask is None else diff * rmask
    var = jnp.sum(diff_m * diff_m, axis=0, keepdims=True) * inv_n
    return diff * lax.rsqrt(var + eps) * gamma + beta


def _self_attention_kernel(x_ref, g1_ref, b1_ref, g2_ref, b2_ref, s_ref, o_ref,
                           *, seq_len, eps):
    x = x_ref[...]                      # [Lp, N] f32 (rows = seq, lanes = batch)
    lp = x.shape[0]

    g1 = g1_ref[...]                    # [Lp, 1]
    b1 = b1_ref[...]
    g2 = g2_ref[...]
    b2 = b2_ref[...]

    # Scalar attention parameters (SMEM): q/k/v in_proj + out_proj, each 1x1.
    wq = s_ref[0]; bq = s_ref[1]
    wk = s_ref[2]; bk = s_ref[3]
    wv = s_ref[4]; bv = s_ref[5]
    wo = s_ref[6]; bo = s_ref[7]

    inv_n = 1.0 / float(seq_len)
    if lp > seq_len:                    # static: only emit masking if L % 8 != 0
        rmask = (lax.broadcasted_iota(jnp.int32, (lp, 1), 0) < seq_len
                 ).astype(jnp.float32)                              # [Lp, 1]
        kmask = lax.broadcasted_iota(jnp.int32, (1, lp, 1), 1) < seq_len
    else:
        rmask = None
        kmask = None

    # layer_norm1 over the sequence axis (the module's embed dim is 1).
    xn = _layernorm_rows(x, g1, b1, rmask, inv_n, eps)

    # Q/K/V projections: embed_dim == 1 -> scalar multiply + bias.
    # Softmax scale is 1/sqrt(head_dim) = 1/sqrt(1) = 1.
    q = wq * xn + bq                    # [Lp, N]
    k = wk * xn + bk
    v = wv * xn + bv

    # Scores per sample are an outer product over the sequence:
    #   s[i, j, b] = q[i, b] * k[j, b]     (batch b on the lane axis)
    s = q[:, None, :] * k[None, :, :]                               # [Lp, Lp, N]
    if kmask is not None:
        s = jnp.where(kmask, s, jnp.float32(-1e30))

    m = jnp.max(s, axis=1, keepdims=True)                           # [Lp, 1, N]
    p = jnp.exp(s - m)
    if kmask is not None:
        p = jnp.where(kmask, p, 0.0)
    denom = jnp.sum(p, axis=1)                                      # [Lp, N]
    num = jnp.sum(p * v[None, :, :], axis=1)                        # [Lp, N]
    attn = num / denom

    out = wo * attn + bo                # out_proj (1x1 linear)

    y = out + x                                                     # + x_original
    y = _layernorm_rows(y, g2, b2, rmask, inv_n, eps) + y           # LN2 + residual
    o_ref[...] = jnp.maximum(y, 0.0)                                # ReLU


def self_attention_forward(x, params, *, max_block_n=512):
    """Fused Pallas forward of SelfAttention.  x: [B, L] float32, L == input_size."""
    B, L = x.shape
    Lp = _round_up(L, 8)                          # sublane-aligned sequence axis
    block_n = min(max_block_n, _round_up(B, 128))  # lane-dense batch tile
    Bp = _round_up(B, block_n)

    # Transposed, padded problem: sequence on sublanes, batch on lanes.
    xT = jnp.zeros((Lp, Bp), jnp.float32).at[:L, :B].set(
        x.astype(jnp.float32).T)

    def pad_col(v):
        return jnp.zeros((Lp, 1), jnp.float32).at[:L, 0].set(
            jnp.asarray(v, jnp.float32))

    g1 = pad_col(params["gamma1"]); b1 = pad_col(params["beta1"])
    g2 = pad_col(params["gamma2"]); b2 = pad_col(params["beta2"])
    scalars = jnp.array(
        [params["wq"], params["bq"], params["wk"], params["bk"],
         params["wv"], params["bv"], params["wo"], params["bo"]],
        dtype=jnp.float32)

    kernel = functools.partial(_self_attention_kernel, seq_len=L, eps=LN_EPS)

    cost = pl.CostEstimate(
        flops=int(Bp * (4 * L * L + 30 * L)),
        transcendentals=int(Bp * (L * L + 2)),
        bytes_accessed=int(4 * (2 * Lp * Bp + 4 * Lp + 8)),
    )

    outT = pl.pallas_call(
        kernel,
        out_shape=jax.ShapeDtypeStruct((Lp, Bp), jnp.float32),
        grid=(Bp // block_n,),
        in_specs=[
            pl.BlockSpec((Lp, block_n), lambda i: (0, i)),          # x tile
            pl.BlockSpec((Lp, 1), lambda i: (0, 0)),                # gamma1
            pl.BlockSpec((Lp, 1), lambda i: (0, 0)),                # beta1
            pl.BlockSpec((Lp, 1), lambda i: (0, 0)),                # gamma2
            pl.BlockSpec((Lp, 1), lambda i: (0, 0)),                # beta2
            pl.BlockSpec(memory_space=pltpu.MemorySpace.SMEM),      # 8 scalars
        ],
        out_specs=pl.BlockSpec((Lp, block_n), lambda i: (0, i)),
        compiler_params=pltpu.CompilerParams(
            dimension_semantics=("parallel",)),
        cost_estimate=cost,
    )(xT, g1, b1, g2, b2, scalars)

    return outT[:L, :B].T


def self_attention_reference(x, params, eps=LN_EPS):
    """Pure-JAX mirror of the PyTorch module forward (for verification)."""
    def ln(z, g, b):
        mean = jnp.mean(z, axis=-1, keepdims=True)
        var = jnp.mean((z - mean) ** 2, axis=-1, keepdims=True)
        return (z - mean) * lax.rsqrt(var + eps) * g + b

    xn = ln(x, params["gamma1"], params["beta1"])
    q = params["wq"] * xn + params["bq"]
    k = params["wk"] * xn + params["bk"]
    v = params["wv"] * xn + params["bv"]
    s = q[:, :, None] * k[:, None, :]          # scale = 1/sqrt(1) = 1
    p = jax.nn.softmax(s, axis=-1)
    attn = jnp.einsum("bij,bj->bi", p, v)
    out = params["wo"] * attn + params["bo"]
    y = out + x
    y = ln(y, params["gamma2"], params["beta2"]) + y
    return jnp.maximum(y, 0.0)


def init_params(input_size, key):
    """Deterministic demo parameters (LayerNorm affine + 1x1 attention projections)."""
    ks = jax.random.split(key, 4)
    return {
        # LayerNorm weights ([input_size, 1] in PyTorch -> stored flat as [L]).
        "gamma1": 1.0 + 0.1 * jax.random.normal(ks[0], (input_size,), jnp.float32),
        "beta1": 0.1 * jax.random.normal(ks[1], (input_size,), jnp.float32),
        "gamma2": 1.0 + 0.1 * jax.random.normal(ks[2], (input_size,), jnp.float32),
        "beta2": 0.1 * jax.random.normal(ks[3], (input_size,), jnp.float32),
        # MultiheadAttention(1, 1): in_proj weight [3,1] + bias [3], out_proj 1x1 + bias.
        "wq": 0.7, "bq": 0.05,
        "wk": -0.4, "bk": -0.02,
        "wv": 0.9, "bv": 0.03,
        "wo": 1.1, "bo": -0.01,
    }


if __name__ == "__main__":
    input_size = 16   # sequence length of the module (feature vector viewed as [L, 1])
    batch = 4

    key = jax.random.PRNGKey(0)
    kx, kp = jax.random.split(key)
    x = jax.random.normal(kx, (batch, input_size), dtype=jnp.float32)
    params = init_params(input_size, kp)

    out = jax.block_until_ready(self_attention_forward(x, params))

    ref = self_attention_reference(x, params)
    assert out.shape == (batch, input_size)
    assert jnp.allclose(out, ref, atol=1e-4, rtol=1e-4), \
        float(jnp.max(jnp.abs(out - ref)))

    # TODO(synk): the module also returns attention weights `w` from
    # nn.MultiheadAttention; they are unused in forward() and not emitted here.
    print("KERNEL_OK")
</pallas_src>

<mosaic_0001>
module attributes {stable_mosaic.version = 11 : i64} {
  func.func @_self_attention_kernel(%arg0: i32, %arg1: memref<16x128xf32, #tpu.memory_space<vmem>>, %arg2: memref<16x1xf32, #tpu.memory_space<vmem>>, %arg3: memref<16x1xf32, #tpu.memory_space<vmem>>, %arg4: memref<16x1xf32, #tpu.memory_space<vmem>>, %arg5: memref<16x1xf32, #tpu.memory_space<vmem>>, %arg6: memref<8xf32, #tpu.memory_space<smem>>, %arg7: memref<16x128xf32, #tpu.memory_space<vmem>>) attributes {dimension_semantics = [#tpu.dimension_semantics<parallel>], iteration_bounds = array<i64: 1>, scalar_prefetch = 0 : i64, scratch_operands = 0 : i64, tpu.core_type = #tpu.core_type<tc>, window_params = [{transform_indices = @transform_0, window_bounds = array<i64: 16, 128>}, {pipeline_mode = #tpu.pipeline_mode<synchronous>, transform_indices = @transform_1, window_bounds = array<i64: 16, 1>}, {pipeline_mode = #tpu.pipeline_mode<synchronous>, transform_indices = @transform_2, window_bounds = array<i64: 16, 1>}, {pipeline_mode = #tpu.pipeline_mode<synchronous>, transform_indices = @transform_3, window_bounds = array<i64: 16, 1>}, {pipeline_mode = #tpu.pipeline_mode<synchronous>, transform_indices = @transform_4, window_bounds = array<i64: 16, 1>}, {transform_indices = @transform_5, window_bounds = array<i64: 8>}, {transform_indices = @transform_6, window_bounds = array<i64: 16, 128>}]} {
    %c0 = arith.constant 0 : index
    %c0_0 = arith.constant 0 : index
    %0 = vector.load %arg1[%c0, %c0_0] : memref<16x128xf32, #tpu.memory_space<vmem>>, vector<16x128xf32>
    %c0_1 = arith.constant 0 : index
    %c0_2 = arith.constant 0 : index
    %1 = vector.load %arg2[%c0_1, %c0_2] : memref<16x1xf32, #tpu.memory_space<vmem>>, vector<16x1xf32>
    %c0_3 = arith.constant 0 : index
    %c0_4 = arith.constant 0 : index
    %2 = vector.load %arg3[%c0_3, %c0_4] : memref<16x1xf32, #tpu.memory_space<vmem>>, vector<16x1xf32>
    %c0_5 = arith.constant 0 : index
    %c0_6 = arith.constant 0 : index
    %3 = vector.load %arg4[%c0_5, %c0_6] : memref<16x1xf32, #tpu.memory_space<vmem>>, vector<16x1xf32>
    %c0_7 = arith.constant 0 : index
    %c0_8 = arith.constant 0 : index
    %4 = vector.load %arg5[%c0_7, %c0_8] : memref<16x1xf32, #tpu.memory_space<vmem>>, vector<16x1xf32>
    %c0_9 = arith.constant 0 : index
    %5 = memref.load %arg6[%c0_9] : memref<8xf32, #tpu.memory_space<smem>>
    %c1 = arith.constant 1 : index
    %6 = memref.load %arg6[%c1] : memref<8xf32, #tpu.memory_space<smem>>
    %c2 = arith.constant 2 : index
    %7 = memref.load %arg6[%c2] : memref<8xf32, #tpu.memory_space<smem>>
    %c3 = arith.constant 3 : index
    %8 = memref.load %arg6[%c3] : memref<8xf32, #tpu.memory_space<smem>>
    %c4 = arith.constant 4 : index
    %9 = memref.load %arg6[%c4] : memref<8xf32, #tpu.memory_space<smem>>
    %c5 = arith.constant 5 : index
    %10 = memref.load %arg6[%c5] : memref<8xf32, #tpu.memory_space<smem>>
    %c6 = arith.constant 6 : index
    %11 = memref.load %arg6[%c6] : memref<8xf32, #tpu.memory_space<smem>>
    %c7 = arith.constant 7 : index
    %12 = memref.load %arg6[%c7] : memref<8xf32, #tpu.memory_space<smem>>
    %cst = arith.constant dense<0.000000e+00> : vector<128xf32>
    %13 = vector.multi_reduction <add>, %0, %cst [0] : vector<16x128xf32> to vector<128xf32>
    %14 = vector.shape_cast %13 : vector<128xf32> to vector<1x128xf32>
    %cst_10 = arith.constant 6.250000e-02 : f32
    %15 = vector.broadcast %cst_10 : f32 to vector<1x128xf32>
    %16 = arith.mulf %14, %15 : vector<1x128xf32>
    %17 = vector.broadcast %16 : vector<1x128xf32> to vector<16x128xf32>
    %18 = arith.subf %0, %17 : vector<16x128xf32>
    %19 = arith.mulf %18, %18 : vector<16x128xf32>
    %cst_11 = arith.constant dense<0.000000e+00> : vector<128xf32>
    %20 = vector.multi_reduction <add>, %19, %cst_11 [0] : vector<16x128xf32> to vector<128xf32>
    %21 = vector.shape_cast %20 : vector<128xf32> to vector<1x128xf32>
    %cst_12 = arith.constant 6.250000e-02 : f32
    %22 = vector.broadcast %cst_12 : f32 to vector<1x128xf32>
    %23 = arith.mulf %21, %22 : vector<1x128xf32>
    %cst_13 = arith.constant 9.99999974E-6 : f32
    %24 = vector.broadcast %cst_13 : f32 to vector<1x128xf32>
    %25 = arith.addf %23, %24 : vector<1x128xf32>
    %26 = math.rsqrt %25 : vector<1x128xf32>
    %27 = vector.broadcast %26 : vector<1x128xf32> to vector<16x128xf32>
    %28 = arith.mulf %18, %27 : vector<16x128xf32>
    %29 = vector.broadcast %1 : vector<16x1xf32> to vector<16x128xf32>
    %30 = arith.mulf %28, %29 : vector<16x128xf32>
    %31 = vector.broadcast %2 : vector<16x1xf32> to vector<16x128xf32>
    %32 = arith.addf %30, %31 : vector<16x128xf32>
    %33 = vector.broadcast %5 : f32 to vector<16x128xf32>
    %34 = arith.mulf %33, %32 : vector<16x128xf32>
    %35 = vector.broadcast %6 : f32 to vector<16x128xf32>
    %36 = arith.addf %34, %35 : vector<16x128xf32>
    %37 = vector.broadcast %7 : f32 to vector<16x128xf32>
    %38 = arith.mulf %37, %32 : vector<16x128xf32>
    %39 = vector.broadcast %8 : f32 to vector<16x128xf32>
    %40 = arith.addf %38, %39 : vector<16x128xf32>
    %41 = vector.broadcast %9 : f32 to vector<16x128xf32>
    %42 = arith.mulf %41, %32 : vector<16x128xf32>
    %43 = vector.broadcast %10 : f32 to vector<16x128xf32>
    %44 = arith.addf %42, %43 : vector<16x128xf32>
    %45 = vector.shape_cast %36 : vector<16x128xf32> to vector<16x1x128xf32>
    %46 = vector.shape_cast %40 : vector<16x128xf32> to vector<1x16x128xf32>
    %47 = vector.broadcast %45 : vector<16x1x128xf32> to vector<16x16x128xf32>
    %48 = vector.broadcast %46 : vector<1x16x128xf32> to vector<16x16x128xf32>
    %49 = arith.mulf %47, %48 : vector<16x16x128xf32>
    %cst_14 = arith.constant dense<0xFF800000> : vector<16x128xf32>
    %50 = vector.multi_reduction <maximumf>, %49, %cst_14 [1] : vector<16x16x128xf32> to vector<16x128xf32>
    %51 = vector.shape_cast %50 : vector<16x128xf32> to vector<16x1x128xf32>
    %52 = vector.broadcast %51 : vector<16x1x128xf32> to vector<16x16x128xf32>
    %53 = arith.subf %49, %52 : vector<16x16x128xf32>
    %54 = math.exp %53 : vector<16x16x128xf32>
    %cst_15 = arith.constant dense<0.000000e+00> : vector<16x128xf32>
    %55 = vector.multi_reduction <add>, %54, %cst_15 [1] : vector<16x16x128xf32> to vector<16x128xf32>
    %56 = vector.shape_cast %44 : vector<16x128xf32> to vector<1x16x128xf32>
    %57 = vector.broadcast %56 : vector<1x16x128xf32> to vector<16x16x128xf32>
    %58 = arith.mulf %54, %57 : vector<16x16x128xf32>
    %cst_16 = arith.constant dense<0.000000e+00> : vector<16x128xf32>
    %59 = vector.multi_reduction <add>, %58, %cst_16 [1] : vector<16x16x128xf32> to vector<16x128xf32>
    %60 = arith.divf %59, %55 : vector<16x128xf32>
    %61 = vector.broadcast %11 : f32 to vector<16x128xf32>
    %62 = arith.mulf %61, %60 : vector<16x128xf32>
    %63 = vector.broadcast %12 : f32 to vector<16x128xf32>
    %64 = arith.addf %62, %63 : vector<16x128xf32>
    %65 = arith.addf %64, %0 : vector<16x128xf32>
    %cst_17 = arith.constant dense<0.000000e+00> : vector<128xf32>
    %66 = vector.multi_reduction <add>, %65, %cst_17 [0] : vector<16x128xf32> to vector<128xf32>
    %67 = vector.shape_cast %66 : vector<128xf32> to vector<1x128xf32>
    %cst_18 = arith.constant 6.250000e-02 : f32
    %68 = vector.broadcast %cst_18 : f32 to vector<1x128xf32>
    %69 = arith.mulf %67, %68 : vector<1x128xf32>
    %70 = vector.broadcast %69 : vector<1x128xf32> to vector<16x128xf32>
    %71 = arith.subf %65, %70 : vector<16x128xf32>
    %72 = arith.mulf %71, %71 : vector<16x128xf32>
    %cst_19 = arith.constant dense<0.000000e+00> : vector<128xf32>
    %73 = vector.multi_reduction <add>, %72, %cst_19 [0] : vector<16x128xf32> to vector<128xf32>
    %74 = vector.shape_cast %73 : vector<128xf32> to vector<1x128xf32>
    %cst_20 = arith.constant 6.250000e-02 : f32
    %75 = vector.broadcast %cst_20 : f32 to vector<1x128xf32>
    %76 = arith.mulf %74, %75 : vector<1x128xf32>
    %cst_21 = arith.constant 9.99999974E-6 : f32
    %77 = vector.broadcast %cst_21 : f32 to vector<1x128xf32>
    %78 = arith.addf %76, %77 : vector<1x128xf32>
    %79 = math.rsqrt %78 : vector<1x128xf32>
    %80 = vector.broadcast %79 : vector<1x128xf32> to vector<16x128xf32>
    %81 = arith.mulf %71, %80 : vector<16x128xf32>
    %82 = vector.broadcast %3 : vector<16x1xf32> to vector<16x128xf32>
    %83 = arith.mulf %81, %82 : vector<16x128xf32>
    %84 = vector.broadcast %4 : vector<16x1xf32> to vector<16x128xf32>
    %85 = arith.addf %83, %84 : vector<16x128xf32>
    %86 = arith.addf %85, %65 : vector<16x128xf32>
    %cst_22 = arith.constant 0.000000e+00 : f32
    %87 = vector.broadcast %cst_22 : f32 to vector<16x128xf32>
    %88 = arith.maximumf %86, %87 : vector<16x128xf32>
    %c0_23 = arith.constant 0 : index
    %c0_24 = arith.constant 0 : index
    %89 = vector.load %arg7[%c0_23, %c0_24] : memref<16x128xf32, #tpu.memory_space<vmem>>, vector<16x128xf32>
    tpu.vector_store %arg7[%c0_23, %c0_24], %88 {strides = array<i32>} : memref<16x128xf32, #tpu.memory_space<vmem>>, vector<16x128xf32>,
    return
  }
  func.func @transform_0(%arg0: i32) -> (i32, i32) {
    %c0_i32 = arith.constant 0 : i32
    %c0_i32_0 = arith.constant 0 : i32
    return %c0_i32, %arg0 : i32, i32
  }
  func.func @transform_1(%arg0: i32) -> (i32, i32) {
    %c0_i32 = arith.constant 0 : i32
    %c0_i32_0 = arith.constant 0 : i32
    %c0_i32_1 = arith.constant 0 : i32
    return %c0_i32, %c0_i32_0 : i32, i32
  }
  func.func @transform_2(%arg0: i32) -> (i32, i32) {
    %c0_i32 = arith.constant 0 : i32
    %c0_i32_0 = arith.constant 0 : i32
    %c0_i32_1 = arith.constant 0 : i32
    return %c0_i32, %c0_i32_0 : i32, i32
  }
  func.func @transform_3(%arg0: i32) -> (i32, i32) {
    %c0_i32 = arith.constant 0 : i32
    %c0_i32_0 = arith.constant 0 : i32
    %c0_i32_1 = arith.constant 0 : i32
    return %c0_i32, %c0_i32_0 : i32, i32
  }
  func.func @transform_4(%arg0: i32) -> (i32, i32) {
    %c0_i32 = arith.constant 0 : i32
    %c0_i32_0 = arith.constant 0 : i32
    %c0_i32_1 = arith.constant 0 : i32
    return %c0_i32, %c0_i32_0 : i32, i32
  }
  func.func @transform_5(%arg0: i32) -> i32 {
    %c0_i32 = arith.constant 0 : i32
    %c0_i32_0 = arith.constant 0 : i32
    return %c0_i32 : i32
  }
  func.func @transform_6(%arg0: i32) -> (i32, i32) {
    %c0_i32 = arith.constant 0 : i32
    %c0_i32_0 = arith.constant 0 : i32
    return %c0_i32, %arg0 : i32, i32
  }
}

</mosaic_0001>

<bundles_post_ra>
// kernel: tpu_custom_call.1
= control target key start
LH: loop header
LB: loop body
LE: loop exit
PB: predicated region body
PF: predicated region fallthrough
CT: control target
= control target key end

     0   :  { %11 = vsyncpa [#allocation4], 0  ;;  %s2233_s0 = inlined_call_operand.vmem [shape: f32[16,128], index: 0, kind: input, shape index: {}]   ;;  %s2234_s1 = inlined_call_operand.vmem [shape: f32[16,1], index: 1, kind: input, shape index: {}]   ;;  %s2235_s2 = inlined_call_operand.vmem [shape: f32[16,1], index: 2, kind: input, shape index: {}]   ;;  %s2236_s3 = inlined_call_operand.vmem [shape: f32[16,1], index: 3, kind: input, shape index: {}]   ;;  %s2237_s4 = inlined_call_operand.vmem [shape: f32[16,1], index: 4, kind: input, shape index: {}]   ;;  %s2238_s5 = inlined_call_operand.vmem [shape: f32[8], index: 5, kind: input, shape index: {}]   ;;  %s2239_s6 = inlined_call_operand.hbm [shape: f32[16,128], index: 6, kind: output, shape index: {}]  }
   0x1   :  { %12 = vsyncpa [#allocation3], 0  ;;  %s29_s23 = sshll.u32 %s2238_s5, 4  ;;  %s30_s23 = int_to_ptr.vmem [resolvable:$true] %s29_s23 }
   0x2   :  { %s1406_s24 = scalar_lea.vmem %s30_s23, 16  ;;  %p1411_p1 = scmp.lt.s32.totalorder %s30_s23, %s30_s23 }
   0x3   :  { %p1407_p0 = scmp.ne.s32.totalorder %s30_s23, %s1406_s24  ;;  %p1412_p2 = scmp.lt.s32.totalorder %s1406_s24, %s1406_s24 }
   0x5   :  { %p1413_p3 = por %p1412_p2, %p1411_p1 }
   0x7   :  { %p1414_p4 = pnand %p1413_p3, %p1407_p0 }
   0x9   :  { %1417 = shalt.err (!%p1414_p4)
}
   0xa   :  { %s1444_s25 = smov [#allocation2]  }
   0xb   :  { %32 = dma.vmem_to_smem %s30_s23, 16, %s1444_s25, [#allocation4]  }
   0xc   :  { %1440 = dma.done.wait [#allocation4], 16  }
   0xd   :  { %1441 = vsyncadd [#allocation4], 4294967280 }
   0xe   :  { %36 = sfence }
   0xf   :  { %v41_v0 = vld [vmem:[%s2235_s2] sm:$0xff]  ;;  %v1445_v2 = vmov 0   ;;  %v42_v3 = vld [vmem:[%s2235_s2 + $0x8] sm:$0xff]  ;;  %v1446_v36 = vmov 1966171168   ;;  %v127_v38 = vlaneseq  ;;  %s1290_s19 = sld [smem:[#allocation2 + $0x2]] }
  0x10   :  { %v39_v1 = vld [vmem:[%s2234_s1] sm:$0xff]  ;;  %1303 = vset.pattern.permute.xlu1 %v1445_v2  ;;  %1302 = vset.pattern.permute.xlu0 %v1445_v2  ;;  %v40_v4 = vld [vmem:[%s2234_s1 + $0x8] sm:$0xff]  ;;  %v125_v37 = vunpack.c.l.s4 %v1446_v36  ;;  %s1292_s20 = sld [smem:[#allocation2 + $0x4]]  ;;  %s1291_s21 = sld [smem:[#allocation2 + $0x3]]  ;;  %vm928_vm0 = vcmask 1041409   ;;  %vm931_vm1 = vcmask 1042434  }
  0x11   :  { %93 = vperm.xlu1 %1303, %v41_v0   ;;  %81 = vperm.xlu0 %1302, %v39_v1   ;;  %v44_v5 = vld [vmem:[%s2236_s3 + $0x8] sm:$0xff]  ;;  %v43_v6 = vld [vmem:[%s2236_s3] sm:$0xff]  ;;  %s47_s3 = sld [smem:[#allocation2]]  ;;  %v128_v46 = vshrl.u32 %v127_v38, 7  ;;  %s1293_s22 = sld [smem:[#allocation2 + $0x5]]  ;;  %vm934_vm2 = vcmask 1043459  }
  0x12   :  { %v46_v7 = vld [vmem:[%s2237_s4 + $0x8] sm:$0xff]  ;;  %v45_v8 = vld [vmem:[%s2237_s4] sm:$0xff]  ;;  %s1289_s4 = sld [smem:[#allocation2 + $0x1]]  ;;  %v126_v45 = vunpack.c.0.s8 %v125_v37  ;;  %s1931_s23 = sld [smem:[#allocation2 + $0x6]]  ;;  %vm937_vm3 = vcmask 1044484   ;;  %vm940_vm4 = vcmask 1045509  }
  0x13   :  { %v37_v9 = vld [vmem:[%s2233_s0] sm:$0xff]  ;;  %v38_v10 = vld [vmem:[%s2233_s0 + $0x8] sm:$0xff]  ;;  %s1940_s24 = sld [smem:[#allocation2 + $0x7]]  ;;  %vm943_vm5 = vcmask 1046534   ;;  %vm946_vm6 = vcmask 1047559  }
  0x14   :  { %v55_v11 = vadd.f32 %v38_v10, %v37_v9  ;;  %v129_v52 = vsub.s32 %v126_v45, %v128_v46 }
  0x15   :  { %98 = vperm.xlu1 %1303, %v42_v3   ;;  %86 = vperm.xlu0 %1302, %v40_v4   ;;  %v109_v54 = vstv %s1290_s19 }
  0x16   :  { %v56_v12 = vrot.slane %v55_v11, 4  ;;  %v115_v57 = vstv %s1292_s20  ;;  %v112_v59 = vstv %s1291_s21 }
  0x17   :  { %v103_v41 = vstv %s47_s3  ;;  %v118_v3 = vstv %s1293_s22 }
  0x18   :  { %v57_v13 = vadd.f32 %v56_v12, %v55_v11  ;;  %v106_v43 = vstv %s1289_s4 }
  0x19   :  { %1090 = vperm.xlu1 %1303, %v44_v5   ;;  %1086 = vperm.xlu0 %1302, %v43_v6   ;;  %v1518_v5 = vsub.s32 0, %v128_v46 }
  0x1a   :  { %v58_v14 = vrot.slane %v57_v13, 2 }
  0x1b   :  { %2261 = vst [vmem:[#allocation8_spill] sm:$0xff] %v1518_v5 }
  0x1c   :  { %v59_v15 = vadd.f32 %v58_v14, %v57_v13 }
  0x1d   :  { %1144 = vperm.xlu1 %1303, %v46_v7   ;;  %1140 = vperm.xlu0 %1302, %v45_v8  }
  0x1e   :  { %v60_v16 = vrot.slane %v59_v15, 1 }
  0x20   :  { %v61_v17 = vadd.f32 %v60_v16, %v59_v15 }
  0x22   :  { %v62_v18 = vmul.f32 0.0625, %v61_v17 }
  0x24   :  { %v63_v19 = vsub.f32 %v37_v9, %v62_v18  ;;  %v64_v20 = vsub.f32 %v38_v10, %v62_v18 }
  0x26   :  { %v65_v21 = vmul.f32 %v63_v19, %v63_v19  ;;  %v66_v22 = vmul.f32 %v64_v20, %v64_v20 }
  0x28   :  { %v67_v23 = vadd.f32 %v66_v22, %v65_v21 }
  0x2a   :  { %v68_v24 = vrot.slane %v67_v23, 4 }
  0x2c   :  { %v69_v25 = vadd.f32 %v68_v24, %v67_v23 }
  0x2e   :  { %v70_v26 = vrot.slane %v69_v25, 2 }
  0x30   :  { %v71_v27 = vadd.f32 %v70_v26, %v69_v25 }
  0x32   :  { %v72_v28 = vrot.slane %v71_v27, 1 }
  0x34   :  { %v73_v29 = vadd.f32 %v72_v28, %v71_v27 }
  0x36   :  { %v74_v30 = vmul.f32 0.0625, %v73_v29 }
  0x38   :  { %v75_v31 = vadd.f32 1e-05, %v74_v30 }
  0x3a   :  { %1304 = vrsqrt.f32 %v75_v31 }
  0x44   :  { %v1305_v32 = vpop.eup %1304 }
  0x45   :  { %v77_v33 = vmul.f32 %v1305_v32, %v63_v19  ;;  %v78_v40 = vmul.f32 %v1305_v32, %v64_v20 }
  0x90   :  { %v94_v34 = vpop.permute.xlu1 %93  ;;  %v82_v35 = vpop.permute.xlu0 %81 }
  0x91   :  { %v89_v39 = vmul.f32 %v82_v35, %v77_v33 }
  0x93   :  { %v101_v42 = vadd.f32 %v94_v34, %v89_v39 }
  0x94   :  { %v87_v44 = vpop.permute.xlu0 %86  ;;  %v99_v49 = vpop.permute.xlu1 %98 }
  0x95   :  { %v104_v47 = vmul.f32 %v103_v41, %v101_v42  ;;  %v90_v48 = vmul.f32 %v87_v44, %v78_v40  ;;  %v110_v60 = vmul.f32 %v109_v54, %v101_v42  ;;  %v116_v63 = vmul.f32 %v115_v57, %v101_v42 }
  0x97   :  { %v107_v50 = vadd.f32 %v106_v43, %v104_v47  ;;  %v102_v51 = vadd.f32 %v99_v49, %v90_v48  ;;  %v1522_v8 = vadd.f32 %v112_v59, %v110_v60  ;;  %v1524_v10 = vadd.f32 %v118_v3, %v116_v63 }
  0x99   :  { %v105_v53 = vmul.f32 %v103_v41, %v102_v51  ;;  %v123_v55 = vcombine.high %v107_v50, %v107_v50  ;;  %v130_v58 = vrot.slane %v107_v50, %v129_v52  ;;  %v111_v1 = vmul.f32 %v109_v54, %v102_v51 }
  0x9a   :  { %v117_v2 = vmul.f32 %v115_v57, %v102_v51 }
  0x9b   :  { %v108_v56 = vadd.f32 %v106_v43, %v105_v53  ;;  %v137_v0 = vrot.slane %v123_v55, %v129_v52  ;;  %v138_v6 = vcombine.high %v130_v58, %v130_v58  ;;  %v1520_v7 = vrot.slane %v130_v58, %v129_v52 }
  0x9c   :  { %v1526_v12 = vadd.f32 %v112_v59, %v111_v1  ;;  %v1528_v13 = vadd.f32 %v118_v3, %v117_v2 }
  0x9d   :  { %v172_v61 = vcombine.high %v108_v56, %v108_v56  ;;  %v179_v62 = vrot.slane %v108_v56, %v129_v52  ;;  %v139_v11 = vcombine.high %v137_v0, %v137_v0  ;;  %v1530_v18 = vrot.slane %v137_v0, %v129_v52 }
  0x9e   :  { %v1532_v19 = vrot.slane %v138_v6, %v129_v52  ;;  %v168_v20 = vcombine.high %v1520_v7, %v1520_v7  ;;  %v1538_v21 = vrot.slane %v1520_v7, %v1518_v5 }
  0x9f   :  { %v186_v4 = vrot.slane %v172_v61, %v129_v52  ;;  %v187_v9 = vcombine.high %v179_v62, %v179_v62  ;;  %v195_v15 = vrot.slane %v179_v62, %v129_v52  ;;  %v1540_v26 = vrot.slane %v139_v11, %v129_v52 }
  0xa1   :  { %v188_v14 = vcombine.high %v186_v4, %v186_v4  ;;  %v202_v16 = vrot.slane %v186_v4, %v129_v52  ;;  %v209_v17 = vrot.slane %v187_v9, %v129_v52  ;;  %v217_v23 = vcombine.high %v195_v15, %v195_v15 }
  0xa2   :  { %v256_v27 = vrot.slane %v195_v15, %v1518_v5 }
  0xa3   :  { %v216_v22 = vrot.slane %v188_v14, %v129_v52  ;;  %v218_v24 = vcombine.high %v202_v16, %v202_v16  ;;  %v219_v25 = vcombine.high %v209_v17, %v209_v17  ;;  %v260_v28 = vrot.slane %v209_v17, %v1518_v5 }
  0xa4   :  { %v272_v29 = vrot.slane %v202_v16, %v1518_v5  ;;  %v264_v31 = vrot.slane %v217_v23, %v1518_v5  ;;  %v1550_v35 = vmul.f32 %v256_v27, %v1522_v8  ;;  %v1553_v36 = vmul.f32 %v256_v27, %v1526_v12 }
  0xa5   :  { %v220_v30 = vcombine.high %v216_v22, %v216_v22  ;;  %v268_v32 = vrot.slane %v219_v25, %v1518_v5  ;;  %v276_v33 = vrot.slane %v216_v22, %v1518_v5  ;;  %v280_v34 = vrot.slane %v218_v24, %v1518_v5 }
  0xa6   :  { %v1556_v37 = vmul.f32 %v260_v28, %v1522_v8  ;;  %v1560_v39 = vmul.f32 %v260_v28, %v1526_v12  ;;  %v1563_v40 = vmul.f32 %v264_v31, %v1522_v8  ;;  %v1566_v41 = vmul.f32 %v264_v31, %v1526_v12 }
  0xa7   :  { %v284_v38 = vrot.slane %v220_v30, %v1518_v5  ;;  %v1569_v42 = vmul.f32 %v268_v32, %v1522_v8  ;;  %v1572_v43 = vmul.f32 %v268_v32, %v1526_v12  ;;  %v1575_v44 = vmul.f32 %v272_v29, %v1522_v8 }
  0xa8   :  { %v1578_v45 = vmul.f32 %v272_v29, %v1526_v12  ;;  %v1581_v46 = vmul.f32 %v276_v33, %v1522_v8  ;;  %v1584_v47 = vmul.f32 %v276_v33, %v1526_v12  ;;  %v1587_v48 = vmul.f32 %v280_v34, %v1522_v8 }
  0xa9   :  { %v1590_v49 = vmul.f32 %v280_v34, %v1526_v12  ;;  %v1593_v50 = vmul.f32 %v284_v38, %v1522_v8  ;;  %v1596_v51 = vmul.f32 %v284_v38, %v1526_v12  ;;  %v389_v52 = vmax.f32 %v1550_v35, %v1553_v36 }
  0xaa   :  { %v396_v53 = vmax.f32 %v1556_v37, %v1560_v39  ;;  %v403_v54 = vmax.f32 %v1563_v40, %v1566_v41  ;;  %v410_v55 = vmax.f32 %v1569_v42, %v1572_v43  ;;  %v417_v56 = vmax.f32 %v1575_v44, %v1578_v45 }
  0xab   :  { %v424_v57 = vmax.f32 %v1581_v46, %v1584_v47  ;;  %v390_v58 = vrot.slane %v389_v52, 4  ;;  %v431_v60 = vmax.f32 %v1587_v48, %v1590_v49  ;;  %v438_v61 = vmax.f32 %v1593_v50, %v1596_v51 }
  0xac   :  { %v397_v59 = vrot.slane %v396_v53, 4  ;;  %v404_v62 = vrot.slane %v403_v54, 4  ;;  %v411_v63 = vrot.slane %v410_v55, 4  ;;  %v418_v0 = vrot.slane %v417_v56, 4 }
  0xad   :  { %v425_v1 = vrot.slane %v424_v57, 4  ;;  %v391_v2 = vmax.f32 %v389_v52, %v390_v58  ;;  %v432_v4 = vrot.slane %v431_v60, 4  ;;  %v439_v6 = vrot.slane %v438_v61, 4 }
  0xae   :  { %v398_v3 = vmax.f32 %v396_v53, %v397_v59  ;;  %v405_v9 = vmax.f32 %v403_v54, %v404_v62  ;;  %v412_v11 = vmax.f32 %v410_v55, %v411_v63  ;;  %v419_v14 = vmax.f32 %v417_v56, %v418_v0 }
  0xaf   :  { %v426_v15 = vmax.f32 %v424_v57, %v425_v1  ;;  %v392_v16 = vrot.slane %v391_v2, 2  ;;  %v433_v22 = vmax.f32 %v431_v60, %v432_v4  ;;  %v440_v23 = vmax.f32 %v438_v61, %v439_v6 }
  0xb0   :  { %v399_v17 = vrot.slane %v398_v3, 2  ;;  %v406_v24 = vrot.slane %v405_v9, 2  ;;  %v413_v25 = vrot.slane %v412_v11, 2  ;;  %v420_v27 = vrot.slane %v419_v14, 2 }
  0xb1   :  { %v427_v28 = vrot.slane %v426_v15, 2  ;;  %v169_v29 = vcombine.high %v1530_v18, %v1530_v18  ;;  %v393_v30 = vmax.f32 %v391_v2, %v392_v16  ;;  %v434_v32 = vrot.slane %v433_v22, 2 }
  0xb2   :  { %v400_v31 = vmax.f32 %v398_v3, %v399_v17  ;;  %v407_v33 = vmax.f32 %v405_v9, %v406_v24  ;;  %v414_v34 = vmax.f32 %v412_v11, %v413_v25  ;;  %v421_v38 = vmax.f32 %v419_v14, %v420_v27 }
  0xb3   :  { %v441_v52 = vrot.slane %v440_v23, 2  ;;  %v170_v53 = vcombine.high %v1532_v19, %v1532_v19  ;;  %v394_v54 = vrot.slane %v393_v30, 1  ;;  %v428_v56 = vmax.f32 %v426_v15, %v427_v28 }
  0xb4   :  { %v401_v55 = vrot.slane %v400_v31, 1  ;;  %v1620_v57 = vrot.slane %v1532_v19, %v1518_v5  ;;  %v1626_v58 = vrot.slane %v168_v20, %v1518_v5  ;;  %v408_v59 = vrot.slane %v407_v33, 1 }
  0xb5   :  { %v415_v60 = vrot.slane %v414_v34, 1  ;;  %v395_v61 = vmax.f32 %v393_v30, %v394_v54  ;;  %v422_v63 = vrot.slane %v421_v38, 1  ;;  %v435_v0 = vmax.f32 %v433_v22, %v434_v32 }
  0xb6   :  { %v402_v62 = vmax.f32 %v400_v31, %v401_v55  ;;  %v1630_v1 = vrot.slane %v1530_v18, %v1518_v5  ;;  %v1634_v19 = vmul.f32 %v1538_v21, %v1522_v8  ;;  %v409_v2 = vmax.f32 %v407_v33, %v408_v59 }
  0xb7   :  { %v442_v3 = vmax.f32 %v440_v23, %v441_v52  ;;  %v416_v4 = vmax.f32 %v414_v34, %v415_v60  ;;  %v429_v7 = vrot.slane %v428_v56, 1  ;;  %v461_v20 = vsub.f32 %v1550_v35, %v395_v61 }
  0xb8   :  { %v462_v6 = vsub.f32 %v1553_v36, %v395_v61  ;;  %v171_v9 = vcombine.high %v1540_v26, %v1540_v26  ;;  %v236_v11 = vrot.slane %v170_v53, %v1518_v5  ;;  %v463_v18 = vsub.f32 %v1556_v37, %v402_v62 }
  0xb9   :  { %v464_v14 = vsub.f32 %v1560_v39, %v402_v62  ;;  %v1645_v15 = vrot.slane %v1540_v26, %v1518_v5  ;;  %v423_v16 = vmax.f32 %v421_v38, %v422_v63  ;;  %v436_v17 = vrot.slane %v435_v0, 1 }
  0xba   :  { %v465_v22 = vsub.f32 %v1563_v40, %v409_v2  ;;  %v1649_v35 = vrot.slane %v169_v29, %v1518_v5  ;;  %v1653_v36 = vmul.f32 %v1620_v57, %v1522_v8  ;;  %v443_v23 = vrot.slane %v442_v3, 1 }
  0xbb   :  { %v466_v37 = vsub.f32 %v1566_v41, %v409_v2  ;;  %v430_v24 = vmax.f32 %v428_v56, %v429_v7  ;;  %v467_v39 = vsub.f32 %v1569_v42, %v416_v4  ;;  %v509_v25 = vmul.f32 1.442695, %v461_v20 }
  0xbc   :  { %v511_v26 = vmul.f32 1.442695, %v462_v6  ;;  %v1659_v27 = vmul.f32 %v1626_v58, %v1522_v8  ;;  %v468_v40 = vsub.f32 %v1572_v43, %v416_v4  ;;  %v513_v28 = vmul.f32 1.442695, %v463_v18 }
  0xbd   :  { %v515_v29 = vmul.f32 1.442695, %v464_v14  ;;  %v437_v30 = vmax.f32 %v435_v0, %v436_v17  ;;  %v469_v31 = vsub.f32 %v1575_v44, %v423_v16  ;;  %1306 = vpow2.f32 %v509_v25 }
  0xbe   :  { %v517_v32 = vmul.f32 1.442695, %v465_v22  ;;  %v444_v33 = vmax.f32 %v442_v3, %v443_v23  ;;  %v470_v41 = vsub.f32 %v1578_v45, %v423_v16  ;;  %1308 = vpow2.f32 %v511_v26 }
  0xbf   :  { %v519_v42 = vmul.f32 1.442695, %v466_v37  ;;  %v1666_v34 = vmul.f32 %v1630_v1, %v1522_v8  ;;  %v471_v38 = vsub.f32 %v1581_v46, %v430_v24  ;;  %1310 = vpow2.f32 %v513_v28 }
  0xc0   :  { %v521_v43 = vmul.f32 1.442695, %v467_v39  ;;  %v252_v52 = vrot.slane %v171_v9, %v1518_v5  ;;  %v472_v53 = vsub.f32 %v1584_v47, %v430_v24  ;;  %1312 = vpow2.f32 %v515_v29 }
  0xc1   :  { %v523_v44 = vmul.f32 1.442695, %v468_v40  ;;  %v473_v54 = vsub.f32 %v1587_v48, %v437_v30  ;;  %v474_v45 = vsub.f32 %v1590_v49, %v437_v30  ;;  %1314 = vpow2.f32 %v517_v32 }
  0xc2   :  { %v525_v55 = vmul.f32 1.442695, %v469_v31  ;;  %v475_v56 = vsub.f32 %v1593_v50, %v444_v33  ;;  %v476_v59 = vsub.f32 %v1596_v51, %v444_v33  ;;  %1316 = vpow2.f32 %v519_v42 }
  0xc3   :  { %v527_v46 = vmul.f32 1.442695, %v470_v41  ;;  %v1676_v60 = vmul.f32 %v236_v11, %v1522_v8  ;;  %1318 = vpow2.f32 %v521_v43  ;;  %v529_v61 = vmul.f32 1.442695, %v471_v38 }
  0xc4   :  { %v1680_v47 = vmul.f32 %v1538_v21, %v1526_v12  ;;  %v1684_v48 = vmul.f32 %v1645_v15, %v1522_v8  ;;  %v1688_v49 = vmul.f32 %v1649_v35, %v1522_v8  ;;  %1320 = vpow2.f32 %v523_v44 }
  0xc5   :  { %v531_v50 = vmul.f32 1.442695, %v472_v53  ;;  %v1691_v51 = vmul.f32 %v252_v52, %v1522_v8  ;;  %1322 = vpow2.f32 %v525_v55  ;;  %v533_v62 = vmul.f32 1.442695, %v473_v54 }
  0xc6   :  { %v535_v63 = vmul.f32 1.442695, %v474_v45  ;;  %1324 = vpow2.f32 %v527_v46  ;;  %v537_v0 = vmul.f32 1.442695, %v475_v56  ;;  %v539_v21 = vmul.f32 1.442695, %v476_v59 }
  0xc7   :  { %v1695_v2 = vmul.f32 %v1620_v57, %v1526_v12  ;;  %v1307_v3 = vpop.eup %1306  ;;  %1326 = vpow2.f32 %v529_v61  ;;  %v1699_v4 = vmul.f32 %v1626_v58, %v1526_v12  ;;  %v1702_v7 = vmul.f32 %v236_v11, %v1526_v12 }
  0xc8   :  { %v333_v8 = vmax.f32 %v1634_v19, %v1680_v47  ;;  %v1309_v20 = vpop.eup %1308  ;;  %1328 = vpow2.f32 %v531_v50  ;;  %v669_v6 = vmul.f32 %v1307_v3, %v1524_v10  ;;  %v1709_v57 = vmul.f32 %v1630_v1, %v1526_v12 }
  0xc9   :  { %v1713_v9 = vmul.f32 %v1645_v15, %v1526_v12  ;;  %v1311_v58 = vpop.eup %1310  ;;  %1330 = vpow2.f32 %v533_v62  ;;  %v597_v18 = vadd.f32 %v1309_v20, %v1307_v3  ;;  %v670_v11 = vmul.f32 %v1309_v20, %v1528_v13 }
  0xca   :  { %v1718_v14 = vmul.f32 %v1649_v35, %v1526_v12  ;;  %v1313_v16 = vpop.eup %1312  ;;  %1332 = vpow2.f32 %v535_v63  ;;  %v671_v17 = vmul.f32 %v1311_v58, %v1524_v10  ;;  %v1722_v1 = vmul.f32 %v252_v52, %v1526_v12 }
  0xcb   :  { %v334_v22 = vrot.slane %v333_v8, 4  ;;  %v1315_v23 = vpop.eup %1314  ;;  %1334 = vpow2.f32 %v537_v0  ;;  %v598_v15 = vrot.slane %v597_v18, 4  ;;  %v604_v37 = vadd.f32 %v1313_v16, %v1311_v58 }
  0xcc   :  { %v672_v24 = vmul.f32 %v1313_v16, %v1528_v13  ;;  %v1317_v39 = vpop.eup %1316  ;;  %1336 = vpow2.f32 %v539_v21  ;;  %v741_v25 = vadd.f32 %v670_v11, %v669_v6  ;;  %v1727_v35 = vmax.f32 %v1653_v36, %v1695_v2 }
  0xcd   :  { %v1731_v26 = vmax.f32 %v1659_v27, %v1699_v4  ;;  %v1319_v12 = vpop.eup %1318  ;;  %v599_v40 = vadd.f32 %v598_v15, %v597_v18  ;;  %v605_v28 = vrot.slane %v604_v37, 4  ;;  %v611_v29 = vadd.f32 %v1317_v39, %v1315_v23 }
  0xce   :  { %v1735_v30 = vmax.f32 %v1676_v60, %v1702_v7  ;;  %v1321_v31 = vpop.eup %1320  ;;  %v742_v32 = vrot.slane %v741_v25, 4  ;;  %v748_v33 = vadd.f32 %v672_v24, %v671_v17  ;;  %v1737_v41 = vmax.f32 %v333_v8, %v334_v22 }
  0xcf   :  { %v1741_v42 = vmax.f32 %v1666_v34, %v1709_v57  ;;  %v1323_v38 = vpop.eup %1322  ;;  %v600_v43 = vrot.slane %v599_v40, 2  ;;  %v606_v52 = vadd.f32 %v605_v28, %v604_v37  ;;  %v612_v53 = vrot.slane %v611_v29, 4 }
  0xd0   :  { %v618_v44 = vadd.f32 %v1321_v31, %v1319_v12  ;;  %v1325_v54 = vpop.eup %1324  ;;  %v673_v45 = vmul.f32 %v1315_v23, %v1524_v10  ;;  %v674_v55 = vmul.f32 %v1317_v39, %v1528_v13  ;;  %v341_v56 = vrot.slane %v1727_v35, 4 }
  0xd1   :  { %v348_v59 = vrot.slane %v1731_v26, 4  ;;  %v1327_v46 = vpop.eup %1326  ;;  %v601_v61 = vadd.f32 %v600_v43, %v599_v40  ;;  %v607_v50 = vrot.slane %v606_v52, 2  ;;  %v613_v62 = vadd.f32 %v612_v53, %v611_v29 }
  0xd2   :  { %v619_v63 = vrot.slane %v618_v44, 4  ;;  %v1329_v0 = vpop.eup %1328  ;;  %v625_v21 = vadd.f32 %v1325_v54, %v1323_v38  ;;  %v675_v3 = vmul.f32 %v1319_v12, %v1524_v10  ;;  %v749_v8 = vrot.slane %v748_v33, 4 }
  0xd3   :  { %v336_v20 = vrot.slane %v1737_v41, 2  ;;  %v1749_v6 = vpop.eup %1330  ;;  %v608_v58 = vadd.f32 %v607_v50, %v606_v52  ;;  %v614_v18 = vrot.slane %v613_v62, 2  ;;  %v743_v16 = vadd.f32 %v742_v32, %v741_v25 }
  0xd4   :  { %v620_v11 = vadd.f32 %v619_v63, %v618_v44  ;;  %v1751_v17 = vpop.eup %1332  ;;  %v626_v22 = vrot.slane %v625_v21, 4  ;;  %v632_v23 = vadd.f32 %v1329_v0, %v1327_v46  ;;  %v676_v15 = vmul.f32 %v1321_v31, %v1528_v13 }
  0xd5   :  { %v1755_v37 = vmul.f32 %v1323_v38, %v1524_v10  ;;  %v1757_v24 = vpop.eup %1334  ;;  %v602_v39 = vrot.slane %v601_v61, 1  ;;  %v609_v12 = vrot.slane %v608_v58, 1  ;;  %v615_v40 = vadd.f32 %v614_v18, %v613_v62 }
  0xd6   :  { %2263 = vst [vmem:[#allocation10_spill] sm:$0xff] %v1757_v24  ;;  %v621_v28 = vrot.slane %v620_v11, 2  ;;  %v1759_v29 = vpop.eup %1336  ;;  %v627_v43 = vadd.f32 %v626_v22, %v625_v21  ;;  %v633_v52 = vrot.slane %v632_v23, 4  ;;  %v639_v25 = vadd.f32 %v1751_v17, %v1749_v6 }
  0xd7   :  { %2262 = vst [vmem:[#allocation9_spill] sm:$0xff] %v1755_v37  ;;  %2264 = vst [vmem:[#allocation11_spill] sm:$0xff] %v1759_v29  ;;  %v750_v32 = vadd.f32 %v749_v8, %v748_v33  ;;  %v616_v53 = vrot.slane %v615_v40, 1  ;;  %v1765_v31 = vadd.f32 %v1759_v29, %v1757_v24  ;;  %v744_v38 = vrot.slane %v743_v16, 2 }
  0xd8   :  { %v622_v44 = vadd.f32 %v621_v28, %v620_v11  ;;  %v628_v50 = vrot.slane %v627_v43, 2  ;;  %v1767_v63 = vadd.f32 %v633_v52, %v632_v23  ;;  %v640_v62 = vrot.slane %v639_v25, 4 }
  0xd9   :  { %v751_v18 = vrot.slane %v750_v32, 2  ;;  %v603_v5 = vadd.f32 %v602_v39, %v601_v61  ;;  %v1770_v21 = vmul.f32 %v1325_v54, %v1528_v13  ;;  %v1772_v22 = vadd.f32 %v674_v55, %v673_v45 }
  0xda   :  { %v623_v37 = vrot.slane %v622_v44, 1  ;;  %v610_v33 = vadd.f32 %v609_v12, %v608_v58  ;;  %v629_v8 = vadd.f32 %v628_v50, %v627_v43  ;;  %v1775_v11 = vmul.f32 %v1327_v46, %v1524_v10 }
  0xdb   :  { %v1778_v28 = vmul.f32 %v1329_v0, %v1528_v13  ;;  %v617_v29 = vadd.f32 %v616_v53, %v615_v40  ;;  %v635_v23 = vrot.slane %v1767_v63, 2  ;;  %v647_v52 = vrot.slane %v1765_v31, 4 }
  0xdc   :  { %v1782_v61 = vadd.f32 %v744_v38, %v743_v16  ;;  %v624_v39 = vadd.f32 %v623_v37, %v622_v44  ;;  %v630_v54 = vrot.slane %v629_v8, 1  ;;  %v1784_v24 = vadd.f32 %v640_v62, %v639_v25 }
  0xdd   :  { %v1786_v45 = vadd.f32 %v751_v18, %v750_v32  ;;  %v756_v55 = vrot.slane %v1772_v22, 4  ;;  %1338 = vrcp.f32 %v603_v5  ;;  %v337_v46 = vmax.f32 %v1737_v41, %v336_v20 }
  0xde   :  { %v342_v0 = vmax.f32 %v1727_v35, %v341_v56  ;;  %v1791_v58 = vadd.f32 %v676_v15, %v675_v3  ;;  %1340 = vrcp.f32 %v610_v33  ;;  %v349_v12 = vmax.f32 %v1731_v26, %v348_v59 }
  0xdf   :  { %v355_v16 = vrot.slane %v1735_v30, 4  ;;  %v1795_v37 = vadd.f32 %v630_v54, %v629_v8  ;;  %1342 = vrcp.f32 %v617_v29  ;;  %v338_v40 = vrot.slane %v337_v46, 1 }
  0xe0   :  { %v343_v43 = vrot.slane %v342_v0, 2  ;;  %1344 = vrcp.f32 %v624_v39  ;;  %v350_v25 = vrot.slane %v349_v12, 2  ;;  %v362_v41 = vrot.slane %v1741_v42, 4 }
  0xe1   :  { %v356_v5 = vmax.f32 %v1735_v30, %v355_v16  ;;  %v339_v20 = vmax.f32 %v337_v46, %v338_v40  ;;  %v368_v56 = vmax.f32 %v1684_v48, %v1713_v9  ;;  %v375_v26 = vmax.f32 %v1688_v49, %v1718_v14 }
  0xe2   :  { %v344_v35 = vmax.f32 %v342_v0, %v343_v43  ;;  %v351_v59 = vmax.f32 %v349_v12, %v350_v25  ;;  %v363_v15 = vmax.f32 %v1741_v42, %v362_v41  ;;  %v382_v29 = vmax.f32 %v1691_v51, %v1722_v1 }
  0xe3   :  { %v357_v3 = vrot.slane %v356_v5, 2  ;;  %v369_v53 = vrot.slane %v368_v56, 4  ;;  %v376_v30 = vrot.slane %v375_v26, 4  ;;  %v445_v44 = vsub.f32 %v1634_v19, %v339_v20 }
  0xe4   :  { %v345_v32 = vrot.slane %v344_v35, 1  ;;  %v352_v38 = vrot.slane %v351_v59, 1  ;;  %v364_v62 = vrot.slane %v363_v15, 2  ;;  %v383_v18 = vrot.slane %v382_v29, 4 }
  0xe5   :  { %v358_v50 = vmax.f32 %v356_v5, %v357_v3  ;;  %v370_v8 = vmax.f32 %v368_v56, %v369_v53  ;;  %v377_v39 = vmax.f32 %v375_v26, %v376_v30  ;;  %v446_v54 = vsub.f32 %v1680_v47, %v339_v20 }
  0xe6   :  { %v346_v33 = vmax.f32 %v344_v35, %v345_v32  ;;  %v353_v46 = vmax.f32 %v351_v59, %v352_v38  ;;  %v365_v42 = vmax.f32 %v363_v15, %v364_v62  ;;  %v384_v12 = vmax.f32 %v382_v29, %v383_v18 }
  0xe7   :  { %v359_v0 = vrot.slane %v358_v50, 1  ;;  %v1808_v16 = vpop.eup %1338  ;;  %v371_v40 = vrot.slane %v370_v8, 2  ;;  %v378_v43 = vrot.slane %v377_v39, 2  ;;  %v477_v15 = vmul.f32 1.442695, %v445_v44 }
  0xe8   :  { %v447_v25 = vsub.f32 %v1653_v36, %v346_v33  ;;  %v448_v19 = vsub.f32 %v1695_v2, %v346_v33  ;;  %v1812_v5 = vpop.eup %1340  ;;  %v366_v35 = vrot.slane %v365_v42, 1  ;;  %v385_v56 = vrot.slane %v384_v12, 2 }
  0xe9   :  { %v360_v41 = vmax.f32 %v358_v50, %v359_v0  ;;  %v449_v26 = vsub.f32 %v1659_v27, %v353_v46  ;;  %v1815_v47 = vpop.eup %1342  ;;  %v372_v20 = vmax.f32 %v370_v8, %v371_v40  ;;  %v379_v59 = vmax.f32 %v377_v39, %v378_v43 }
  0xea   :  { %v450_v3 = vsub.f32 %v1699_v4, %v353_v46  ;;  %v1818_v29 = vpop.eup %1344  ;;  %v367_v32 = vmax.f32 %v365_v42, %v366_v35  ;;  %v386_v36 = vmax.f32 %v384_v12, %v385_v56  ;;  %1346 = vpow2.f32 %v477_v15 }
  0xeb   :  { %v451_v2 = vsub.f32 %v1676_v60, %v360_v41  ;;  %v452_v53 = vsub.f32 %v1702_v7, %v360_v41  ;;  %v373_v30 = vrot.slane %v372_v20, 1  ;;  %v380_v38 = vrot.slane %v379_v59, 1 }
  0xec   :  { %v479_v50 = vmul.f32 1.442695, %v446_v54  ;;  %v387_v27 = vrot.slane %v386_v36, 1  ;;  %v453_v62 = vsub.f32 %v1666_v34, %v367_v32  ;;  %v454_v18 = vsub.f32 %v1709_v57, %v367_v32 }
  0xed   :  { %v481_v33 = vmul.f32 1.442695, %v447_v25  ;;  %v374_v4 = vmax.f32 %v372_v20, %v373_v30  ;;  %v381_v44 = vmax.f32 %v379_v59, %v380_v38  ;;  %v483_v8 = vmul.f32 1.442695, %v448_v19 }
  0xee   :  { %1348 = vpow2.f32 %v479_v50  ;;  %v388_v39 = vmax.f32 %v386_v36, %v387_v27  ;;  %v485_v46 = vmul.f32 1.442695, %v449_v26  ;;  %v487_v60 = vmul.f32 1.442695, %v450_v3 }
  0xef   :  { %1350 = vpow2.f32 %v481_v33  ;;  %v642_v7 = vrot.slane %v1784_v24, 2  ;;  %v1828_v54 = vadd.f32 %v756_v55, %v1772_v22  ;;  %v455_v34 = vsub.f32 %v1684_v48, %v374_v4  ;;  %v2265_v48 = vld [vmem:[#allocation9_spill] sm:$0xff] }
  0xf0   :  { %1352 = vrcp.f32 %v1795_v37  ;;  %v456_v57 = vsub.f32 %v1713_v9, %v374_v4  ;;  %v457_v0 = vsub.f32 %v1688_v49, %v381_v44  ;;  %v489_v42 = vmul.f32 1.442695, %v451_v2 }
  0xf1   :  { %1354 = vpow2.f32 %v483_v8  ;;  %v458_v12 = vsub.f32 %v1718_v14, %v381_v44  ;;  %v491_v40 = vmul.f32 1.442695, %v452_v53  ;;  %v493_v43 = vmul.f32 1.442695, %v453_v62  ;;  %v2266_v53 = vld [vmem:[#allocation10_spill] sm:$0xff] }
  0xf2   :  { %1356 = vpow2.f32 %v485_v46  ;;  %v636_v22 = vadd.f32 %v635_v23, %v1767_v63  ;;  %v459_v55 = vsub.f32 %v1691_v51, %v388_v39  ;;  %v495_v37 = vmul.f32 1.442695, %v454_v18 }
  0xf3   :  { %1358 = vpow2.f32 %v487_v60  ;;  %v1841_v9 = vadd.f32 %v1770_v21, %v2265_v48  ;;  %v460_v49 = vsub.f32 %v1722_v1, %v388_v39  ;;  %v497_v25 = vmul.f32 1.442695, %v455_v34 }
  0xf4   :  { %1360 = vpow2.f32 %v489_v42  ;;  %v499_v19 = vmul.f32 1.442695, %v456_v57  ;;  %v648_v63 = vadd.f32 %v647_v52, %v1765_v31  ;;  %v1347_v23 = vpop.eup %1346  ;;  %v501_v51 = vmul.f32 1.442695, %v457_v0  ;;  %v2268_v57 = vld [vmem:[#allocation11_spill] sm:$0xff] }
  0xf5   :  { %1362 = vpow2.f32 %v491_v40  ;;  %v503_v41 = vmul.f32 1.442695, %v458_v12  ;;  %v643_v35 = vadd.f32 %v642_v7, %v1784_v24  ;;  %v505_v21 = vmul.f32 1.442695, %v459_v55 }
  0xf6   :  { %1364 = vpow2.f32 %v493_v43  ;;  %v637_v56 = vrot.slane %v636_v22, 1  ;;  %v649_v1 = vrot.slane %v648_v63, 2  ;;  %v507_v20 = vmul.f32 1.442695, %v460_v49 }
  0xf7   :  { %1366 = vpow2.f32 %v495_v37  ;;  %v653_v59 = vmul.f32 %v1347_v23, %v1524_v10  ;;  %v1852_v3 = vmul.f32 %v1749_v6, %v1524_v10  ;;  %v1856_v24 = vmul.f32 %v1751_v17, %v1528_v13 }
  0xf8   :  { %v1349_v26 = vpop.eup %1348  ;;  %1368 = vpow2.f32 %v497_v25  ;;  %v650_v15 = vadd.f32 %v649_v1, %v648_v63  ;;  %v644_v36 = vrot.slane %v643_v35, 1  ;;  %v1863_v30 = vmul.f32 %v2266_v53, %v1524_v10 }
  0xf9   :  { %v1351_v31 = vpop.eup %1350  ;;  %1370 = vpow2.f32 %v499_v19  ;;  %v541_v52 = vadd.f32 %v1349_v26, %v1347_v23  ;;  %v654_v2 = vmul.f32 %v1349_v26, %v1528_v13  ;;  %v1865_v50 = vadd.f32 %v637_v56, %v636_v22 }
  0xfa   :  { %v1858_v32 = vpop.eup %1352  ;;  %1372 = vpow2.f32 %v501_v51  ;;  %v746_v27 = vrot.slane %v1782_v61, 1  ;;  %v651_v18 = vrot.slane %v650_v15, 1  ;;  %v655_v8 = vmul.f32 %v1351_v31, %v1524_v10 }
  0xfb   :  { %v1355_v6 = vpop.eup %1354  ;;  %1374 = vpow2.f32 %v503_v41  ;;  %v542_v38 = vrot.slane %v541_v52, 4  ;;  %v685_v33 = vadd.f32 %v654_v2, %v653_v59  ;;  %v1870_v34 = vadd.f32 %v644_v36, %v643_v35 }
  0xfc   :  { %v1357_v62 = vpop.eup %1356  ;;  %1376 = vpow2.f32 %v505_v21  ;;  %v548_v17 = vadd.f32 %v1355_v6, %v1351_v31  ;;  %v656_v39 = vmul.f32 %v1355_v6, %v1528_v13  ;;  %v1874_v0 = vmul.f32 %v2268_v57, %v1528_v13 }
  0xfd   :  { %v1359_v4 = vpop.eup %1358  ;;  %1378 = vpow2.f32 %v507_v20  ;;  %v543_v44 = vadd.f32 %v542_v38, %v541_v52  ;;  %2267 = vst [vmem:[#allocation9_spill] sm:$0xff] %v1870_v34  ;;  %v686_v40 = vrot.slane %v685_v33, 4  ;;  %v1877_v43 = vadd.f32 %v746_v27, %v1782_v61 }
  0xfe   :  { %v1361_v46 = vpop.eup %1360  ;;  %v549_v60 = vrot.slane %v548_v17, 4  ;;  %v555_v7 = vadd.f32 %v1359_v4, %v1357_v62  ;;  %v753_v22 = vrot.slane %v1786_v45, 1  ;;  %v1880_v25 = vadd.f32 %v651_v18, %v650_v15 }
  0xff   :  { %v1363_v42 = vpop.eup %1362  ;;  %v544_v12 = vrot.slane %v543_v44, 2  ;;  %v657_v23 = vmul.f32 %v1357_v62, %v1524_v10  ;;  %v658_v51 = vmul.f32 %v1359_v4, %v1528_v13  ;;  %v692_v41 = vadd.f32 %v656_v39, %v655_v8 }
 0x100   :  { %v1365_v55 = vpop.eup %1364  ;;  %v550_v37 = vadd.f32 %v549_v60, %v548_v17  ;;  %v556_v48 = vrot.slane %v555_v7, 4  ;;  %v562_v49 = vadd.f32 %v1363_v42, %v1361_v46  ;;  %2269 = vst [vmem:[#allocation10_spill] sm:$0xff] %v1880_v25  ;;  %v659_v59 = vmul.f32 %v1361_v46, %v1524_v10 }
 0x101   :  { %v1367_v19 = vpop.eup %1366  ;;  %v545_v63 = vadd.f32 %v544_v12, %v543_v44  ;;  %v687_v31 = vadd.f32 %v686_v40, %v685_v33  ;;  %v1886_v52 = vadd.f32 %v753_v22, %v1786_v45  ;;  %v660_v62 = vmul.f32 %v1363_v42, %v1528_v13 }
 0x102   :  { %v1369_v35 = vpop.eup %1368  ;;  %v551_v21 = vrot.slane %v550_v37, 2  ;;  %v557_v56 = vadd.f32 %v556_v48, %v555_v7  ;;  %v563_v61 = vrot.slane %v562_v49, 4  ;;  %v569_v1 = vadd.f32 %v1367_v19, %v1365_v55 }
 0x103   :  { %v1371_v26 = vpop.eup %1370  ;;  %v546_v20 = vrot.slane %v545_v63, 1  ;;  %v661_v17 = vmul.f32 %v1365_v55, %v1524_v10  ;;  %v693_v18 = vrot.slane %v692_v41, 4  ;;  %v662_v33 = vmul.f32 %v1367_v19, %v1528_v13 }
 0x104   :  { %v1373_v15 = vpop.eup %1372  ;;  %v552_v36 = vadd.f32 %v551_v21, %v550_v37  ;;  %v558_v2 = vrot.slane %v557_v56, 2  ;;  %v564_v53 = vadd.f32 %v563_v61, %v562_v49  ;;  %v570_v6 = vrot.slane %v569_v1, 4 }
 0x105   :  { %v1375_v38 = vpop.eup %1374  ;;  %v576_v27 = vadd.f32 %v1371_v26, %v1369_v35  ;;  %v663_v7 = vmul.f32 %v1369_v35, %v1524_v10  ;;  %v688_v57 = vrot.slane %v687_v31, 2  ;;  %v1892_v12 = vadd.f32 %v546_v20, %v545_v63 }
 0x106   :  { %v1377_v4 = vpop.eup %1376  ;;  %v559_v44 = vadd.f32 %v558_v2, %v557_v56  ;;  %v565_v8 = vrot.slane %v564_v53, 2  ;;  %v571_v39 = vadd.f32 %v570_v6, %v569_v1  ;;  %v583_v60 = vadd.f32 %v1375_v38, %v1373_v15 }
 0x107   :  { %v1379_v45 = vpop.eup %1378  ;;  %v577_v46 = vrot.slane %v576_v27, 4  ;;  %v553_v40 = vrot.slane %v552_v36, 1  ;;  %v664_v49 = vmul.f32 %v1371_v26, %v1528_v13  ;;  %v665_v19 = vmul.f32 %v1373_v15, %v1524_v10 }
 0x108   :  { %v566_v22 = vadd.f32 %v565_v8, %v564_v53  ;;  %v572_v42 = vrot.slane %v571_v39, 2  ;;  %v584_v55 = vrot.slane %v583_v60, 4  ;;  %v590_v48 = vadd.f32 %v1379_v45, %v1377_v4 }
 0x109   :  { %v578_v37 = vadd.f32 %v577_v46, %v576_v27  ;;  %v560_v21 = vrot.slane %v559_v44, 1  ;;  %v666_v61 = vmul.f32 %v1375_v38, %v1528_v13  ;;  %v694_v6 = vadd.f32 %v693_v18, %v692_v41 }
 0x10a   :  { %v573_v56 = vadd.f32 %v572_v42, %v571_v39  ;;  %v585_v2 = vadd.f32 %v584_v55, %v583_v60  ;;  %v591_v35 = vrot.slane %v590_v48, 4  ;;  %v1897_v63 = vadd.f32 %v553_v40, %v552_v36 }
 0x10b   :  { %v579_v1 = vrot.slane %v578_v37, 2  ;;  %v567_v20 = vrot.slane %v566_v22, 1  ;;  %v667_v53 = vmul.f32 %v1377_v4, %v1524_v10  ;;  %v699_v27 = vadd.f32 %v658_v51, %v657_v23 }
 0x10c   :  { %v586_v8 = vrot.slane %v585_v2, 2  ;;  %v592_v46 = vadd.f32 %v591_v35, %v590_v48  ;;  %v689_v14 = vadd.f32 %v688_v57, %v687_v31  ;;  %v695_v26 = vrot.slane %v694_v6, 2 }
 0x10d   :  { %v1900_v25 = vadd.f32 %v560_v21, %v559_v44  ;;  %v668_v15 = vmul.f32 %v1379_v45, %v1528_v13  ;;  %v700_v39 = vrot.slane %v699_v27, 4  ;;  %v706_v38 = vadd.f32 %v660_v62, %v659_v59 }
 0x10e   :  { %v574_v42 = vrot.slane %v573_v56, 1  ;;  %v580_v60 = vadd.f32 %v579_v1, %v578_v37  ;;  %v587_v55 = vadd.f32 %v586_v8, %v585_v2  ;;  %v593_v41 = vrot.slane %v592_v46, 2 }
 0x10f   :  { %v701_v36 = vadd.f32 %v700_v39, %v699_v27  ;;  %v707_v18 = vrot.slane %v706_v38, 4  ;;  %v713_v40 = vadd.f32 %v662_v33, %v661_v17  ;;  %v720_v34 = vadd.f32 %v664_v49, %v663_v7 }
 0x110   :  { %v1903_v10 = vadd.f32 %v567_v20, %v566_v22  ;;  %v594_v23 = vadd.f32 %v593_v41, %v592_v46  ;;  %v690_v51 = vrot.slane %v689_v14, 1  ;;  %v696_v31 = vadd.f32 %v695_v26, %v694_v6 }
 0x111   :  { %v702_v4 = vrot.slane %v701_v36, 2  ;;  %v708_v44 = vadd.f32 %v707_v18, %v706_v38  ;;  %v714_v57 = vrot.slane %v713_v40, 4  ;;  %v721_v48 = vrot.slane %v720_v34, 4 }
 0x112   :  { %v1905_v13 = vadd.f32 %v574_v42, %v573_v56  ;;  %v581_v59 = vrot.slane %v580_v60, 1  ;;  %v588_v62 = vrot.slane %v587_v55, 1  ;;  %v727_v45 = vadd.f32 %v666_v61, %v665_v19 }
 0x113   :  { %v703_v37 = vadd.f32 %v702_v4, %v701_v36  ;;  %v709_v21 = vrot.slane %v708_v44, 2  ;;  %v715_v1 = vadd.f32 %v714_v57, %v713_v40  ;;  %v722_v2 = vadd.f32 %v721_v48, %v720_v34 }
 0x114   :  { %v697_v17 = vrot.slane %v696_v31, 1  ;;  %v728_v33 = vrot.slane %v727_v45, 4  ;;  %v734_v7 = vadd.f32 %v668_v15, %v667_v53  ;;  %v2270_v22 = vrot.slane %v1828_v54, 2 }
 0x115   :  { %v595_v35 = vrot.slane %v594_v23, 1  ;;  %v704_v6 = vrot.slane %v703_v37, 1  ;;  %v710_v20 = vadd.f32 %v709_v21, %v708_v44  ;;  %v716_v27 = vrot.slane %v715_v1, 2 }
 0x116   :  { %v759_v49 = vadd.f32 %v2270_v22, %v1828_v54  ;;  %v723_v56 = vrot.slane %v722_v2, 2  ;;  %v729_v8 = vadd.f32 %v728_v33, %v727_v45  ;;  %v735_v46 = vrot.slane %v734_v7, 4 }
 0x117   :  { %v763_v19 = vrot.slane %v1791_v58, 4  ;;  %v582_v61 = vadd.f32 %v581_v59, %v580_v60  ;;  %v1911_v26 = vadd.f32 %v690_v51, %v689_v14  ;;  %v711_v34 = vrot.slane %v710_v20, 1 }
 0x118   :  { %v760_v39 = vrot.slane %v759_v49, 1  ;;  %v589_v38 = vadd.f32 %v588_v62, %v587_v55  ;;  %v717_v53 = vadd.f32 %v716_v27, %v715_v1  ;;  %v736_v15 = vadd.f32 %v735_v46, %v734_v7 }
 0x119   :  { %v764_v42 = vadd.f32 %v763_v19, %v1791_v58  ;;  %v596_v54 = vadd.f32 %v595_v35, %v594_v23  ;;  %v1914_v41 = vadd.f32 %v697_v17, %v696_v31  ;;  %v1916_v36 = vadd.f32 %v704_v6, %v703_v37 }
 0x11a   :  { %v770_v18 = vrot.slane %v1841_v9, 4  ;;  %v1919_v40 = vadd.f32 %v723_v56, %v722_v2  ;;  %v730_v4 = vrot.slane %v729_v8, 2  ;;  %v776_v14 = vadd.f32 %v1778_v28, %v1775_v11 }
 0x11b   :  { %v765_v60 = vrot.slane %v764_v42, 2  ;;  %v1923_v51 = vadd.f32 %v711_v34, %v710_v20  ;;  %v761_v55 = vadd.f32 %v760_v39, %v759_v49  ;;  %v783_v58 = vadd.f32 %v1856_v24, %v1852_v3 }
 0x11c   :  { %v771_v44 = vadd.f32 %v770_v18, %v1841_v9  ;;  %v718_v23 = vrot.slane %v717_v53, 1  ;;  %v737_v31 = vrot.slane %v736_v15, 2  ;;  %v777_v48 = vrot.slane %v776_v14, 4 }
 0x11d   :  { %v766_v57 = vadd.f32 %v765_v60, %v764_v42  ;;  %v784_v62 = vrot.slane %v783_v58, 4  ;;  %v790_v45 = vadd.f32 %v1874_v0, %v1863_v30  ;;  %1380 = vrcp.f32 %v1892_v12 }
 0x11e   :  { %v772_v59 = vrot.slane %v771_v44, 2  ;;  %v725_v11 = vrot.slane %v1919_v40, 1  ;;  %v731_v28 = vadd.f32 %v730_v4, %v729_v8  ;;  %v778_v37 = vadd.f32 %v777_v48, %v776_v14 }
 0x11f   :  { %v767_v9 = vrot.slane %v766_v57, 1  ;;  %v785_v3 = vadd.f32 %v784_v62, %v783_v58  ;;  %v791_v24 = vrot.slane %v790_v45, 4  ;;  %1382 = vrcp.f32 %v1897_v63 }
 0x120   :  { %v773_v21 = vadd.f32 %v772_v59, %v771_v44  ;;  %v719_v1 = vadd.f32 %v718_v23, %v717_v53  ;;  %v738_v2 = vadd.f32 %v737_v31, %v736_v15  ;;  %v779_v17 = vrot.slane %v778_v37, 2 }
 0x121   :  { %1384 = vrcp.f32 %v1900_v25  ;;  %v786_v0 = vrot.slane %v785_v3, 2  ;;  %v792_v12 = vadd.f32 %v791_v24, %v790_v45  ;;  %v768_v33 = vadd.f32 %v767_v9, %v766_v57 }
 0x122   :  { %v774_v30 = vrot.slane %v773_v21, 1  ;;  %1386 = vrcp.f32 %v1903_v10  ;;  %v780_v7 = vadd.f32 %v779_v17, %v778_v37  ;;  %v814_v22 = vmul.f32 %v1808_v16, %v1877_v43 }
 0x123   :  { %1388 = vrcp.f32 %v1905_v13  ;;  %v787_v49 = vadd.f32 %v786_v0, %v785_v3  ;;  %v793_v35 = vrot.slane %v792_v12, 2  ;;  %v732_v25 = vrot.slane %v731_v28, 1 }
 0x124   :  { %v775_v63 = vadd.f32 %v774_v30, %v773_v21  ;;  %1390 = vrcp.f32 %v582_v61  ;;  %v816_v6 = vmul.f32 %v1812_v5, %v1886_v52  ;;  %v818_v10 = vmul.f32 %v1815_v47, %v761_v55  ;;  %v2271_v61 = vld [vmem:[#allocation9_spill] sm:$0xff]  ;;  %v2272_v52 = vld [vmem:[#allocation10_spill] sm:$0xff] }
 0x125   :  { %1392 = vrcp.f32 %v589_v38  ;;  %v794_v20 = vadd.f32 %v793_v35, %v792_v12  ;;  %v820_v13 = vmul.f32 %v1818_v29, %v768_v33  ;;  %v739_v43 = vrot.slane %v738_v2, 1 }
 0x126   :  { %1394 = vrcp.f32 %v596_v54  ;;  %v822_v16 = vmul.f32 %v1858_v32, %v775_v63  ;;  %v781_v27 = vrot.slane %v780_v7, 1  ;;  %v1949_v56 = vstv %s1931_s23 }
 0x127   :  { %1396 = vrcp.f32 %v1865_v50  ;;  %v1381_v8 = vpop.eup %1380  ;;  %v788_v46 = vrot.slane %v787_v49, 1  ;;  %v795_v19 = vrot.slane %v794_v20, 1  ;;  %v838_v5 = vmul.f32 %v1949_v56, %v814_v22 }
 0x128   :  { %1398 = vrcp.f32 %v2271_v61  ;;  %v798_v47 = vmul.f32 %v1381_v8, %v1911_v26  ;;  %v839_v29 = vmul.f32 %v1949_v56, %v816_v6  ;;  %v840_v32 = vmul.f32 %v1949_v56, %v818_v10 }
 0x129   :  { %1400 = vrcp.f32 %v2272_v52  ;;  %v1383_v34 = vpop.eup %1382  ;;  %v726_v50 = vadd.f32 %v725_v11, %v1919_v40  ;;  %v733_v39 = vadd.f32 %v732_v25, %v731_v28  ;;  %v841_v38 = vmul.f32 %v1949_v56, %v820_v13 }
 0x12a   :  { %v842_v53 = vmul.f32 %v1949_v56, %v822_v16  ;;  %v740_v42 = vadd.f32 %v739_v43, %v738_v2  ;;  %v782_v54 = vadd.f32 %v781_v27, %v780_v7  ;;  %v800_v26 = vmul.f32 %v1383_v34, %v1914_v41 }
 0x12b   :  { %v1385_v15 = vpop.eup %1384  ;;  %v830_v18 = vmul.f32 %v1949_v56, %v798_v47  ;;  %v789_v60 = vadd.f32 %v788_v46, %v787_v49  ;;  %v796_v14 = vadd.f32 %v795_v19, %v794_v20  ;;  %v846_v44 = vstv %s1940_s24 }
 0x12c   :  { %v1387_v4 = vpop.eup %1386  ;;  %v802_v55 = vmul.f32 %v1385_v15, %v1916_v36  ;;  %v1965_v23 = vadd.f32 %v846_v44, %v838_v5  ;;  %v856_v31 = vadd.f32 %v846_v44, %v839_v29  ;;  %v857_v57 = vadd.f32 %v846_v44, %v840_v32  ;;  %v1405_v5 = vld [vmem:[%s2233_s0 + $0x8] sm:$0xff] }
 0x12d   :  { %v1389_v58 = vpop.eup %1388  ;;  %v804_v40 = vmul.f32 %v1387_v4, %v1923_v51  ;;  %v831_v62 = vmul.f32 %v1949_v56, %v800_v26  ;;  %v858_v41 = vadd.f32 %v846_v44, %v841_v38  ;;  %v1968_v45 = vadd.f32 %v846_v44, %v842_v53  ;;  %v1404_v51 = vld [vmem:[%s2233_s0] sm:$0xff]  ;;  %s1447_s0 = smov [#allocation5]  }
 0x12e   :  { %v1391_v48 = vpop.eup %1390  ;;  %v806_v59 = vmul.f32 %v1389_v58, %v719_v1  ;;  %v832_v9 = vmul.f32 %v1949_v56, %v802_v55  ;;  %v847_v36 = vadd.f32 %v846_v44, %v830_v18  ;;  %v865_v37 = vrot.slane %v1404_v51, 1  ;;  %s1277_s29 = sshll.u32 %s1447_s0, 4  ;;  %s1278_s29 = int_to_ptr.vmem [resolvable:$true] %s1277_s29 }
 0x12f   :  { %v1393_v11 = vpop.eup %1392  ;;  %v808_v28 = vmul.f32 %v1391_v48, %v726_v50  ;;  %v833_v24 = vmul.f32 %v1949_v56, %v804_v40  ;;  %v866_v1 = vrot.slane %v1404_v51, 2  ;;  %v867_v2 = vrot.slane %v1404_v51, 3  ;;  %s1418_s5 = scalar_lea.vmem %s1278_s29, 256  ;;  %p1423_p6 = scmp.lt.s32.totalorder %s1278_s29, %s1278_s29 }
 0x130   :  { %v1395_v21 = vpop.eup %1394  ;;  %v810_v3 = vmul.f32 %v1393_v11, %v733_v39  ;;  %v834_v0 = vmul.f32 %v1949_v56, %v806_v59  ;;  %v868_v33 = vrot.slane %v1404_v51, 4  ;;  %v848_v49 = vadd.f32 %v846_v44, %v831_v62  ;;  %p1419_p5 = scmp.ne.s32.totalorder %s1278_s29, %s1418_s5  ;;  %p1424_p7 = scmp.lt.s32.totalorder %s1418_s5, %s1418_s5 }
 0x131   :  { %v1397_v17 = vpop.eup %1396  ;;  %v812_v30 = vmul.f32 %v1395_v21, %v740_v42  ;;  %v835_v12 = vmul.f32 %v1949_v56, %v808_v28  ;;  %v869_v35 = vrot.slane %v1404_v51, 5  ;;  %v849_v20 = vadd.f32 %v846_v44, %v832_v9 }
 0x132   :  { %v1399_v7 = vpop.eup %1398  ;;  %v824_v22 = vmul.f32 %v1397_v17, %v782_v54  ;;  %v836_v63 = vmul.f32 %v1949_v56, %v810_v3  ;;  %v870_v13 = vrot.slane %v1404_v51, 6  ;;  %v850_v27 = vadd.f32 %v846_v44, %v833_v24  ;;  %p1425_p8 = por %p1424_p7, %p1423_p6 }
 0x133   :  { %v1401_v25 = vpop.eup %1400  ;;  %v826_v6 = vmul.f32 %v1399_v7, %v789_v60  ;;  %v837_v10 = vmul.f32 %v1949_v56, %v812_v30  ;;  %v871_v8 = vrot.slane %v1404_v51, 7  ;;  %v851_v19 = vadd.f32 %v846_v44, %v834_v0 }
 0x134   :  { %v828_v16 = vmul.f32 %v1401_v25, %v796_v14  ;;  %v843_v43 = vmul.f32 %v1949_v56, %v824_v22  ;;  %v852_v61 = vadd.f32 %v846_v44, %v835_v12  ;;  %v872_v47 = vrot.slane %v1405_v5, 1  ;;  %p1426_p9 = pnand %p1425_p8, %p1419_p5 }
 0x135   :  { %v844_v46 = vmul.f32 %v1949_v56, %v826_v6  ;;  %v853_v29 = vadd.f32 %v846_v44, %v836_v63  ;;  %v873_v32 = vrot.slane %v1405_v5, 2  ;;  %v874_v34 = vrot.slane %v1405_v5, 3 }
 0x136   :  { %v845_v52 = vmul.f32 %v1949_v56, %v828_v16  ;;  %v854_v50 = vadd.f32 %v846_v44, %v837_v10  ;;  %v875_v39 = vrot.slane %v1405_v5, 4  ;;  %v876_v38 = vrot.slane %v1405_v5, 5 }
 0x137   :  { %v1985_v53 = vadd.f32 %v865_v37, %v848_v49  ;;  %v860_v15 = vadd.f32 %v846_v44, %v843_v43  ;;  %v877_v42 = vrot.slane %v1405_v5, 6  ;;  %v1987_v54 = vadd.f32 %v866_v1, %v849_v20 }
 0x138   :  { %v1989_v26 = vadd.f32 %v867_v2, %v850_v27  ;;  %v861_v18 = vadd.f32 %v846_v44, %v844_v46  ;;  %v862_v4 = vadd.f32 %v846_v44, %v845_v52  ;;  %v878_v60 = vrot.slane %v1405_v5, 7  ;;  %v2289_v52 = vld [vmem:[#allocation8_spill] sm:$0xff] }
 0x139   :  { %2273 = vst [vmem:[#allocation11_spill] sm:$0xff] %v1985_v53  ;;  %2274 = vst [vmem:[#allocation9_spill] sm:$0xff] %v1987_v54  ;;  %v1991_v14 = vadd.f32 %v1404_v51, %v847_v36  ;;  %v1993_v56 = vadd.f32 %v868_v33, %v851_v19  ;;  %v1995_v55 = vadd.f32 %v869_v35, %v852_v61  ;;  %v927_v62 = vrot.slane %v1985_v53, 7 }
 0x13a   :  { %2275 = vst [vmem:[#allocation10_spill] sm:$0xff] %v1989_v26  ;;  %v1997_v58 = vadd.f32 %v870_v13, %v853_v29  ;;  %v1999_v40 = vadd.f32 %v872_v47, %v856_v31  ;;  %v2001_v48 = vadd.f32 %v873_v32, %v857_v57  ;;  %v2003_v59 = vadd.f32 %v874_v34, %v858_v41 }
 0x13b   :  { %2276 = vst [vmem:[#allocation12_spill] sm:$0xff] %v1991_v14  ;;  %2277 = vst [vmem:[#allocation13_spill] sm:$0xff] %v1993_v56  ;;  %v930_v44 = vrot.slane %v1987_v54, 6  ;;  %v933_v11 = vrot.slane %v1989_v26, 5  ;;  %v2008_v28 = vadd.f32 %v871_v8, %v854_v50  ;;  %v2011_v9 = vadd.f32 %v1405_v5, %v1965_v23 }
 0x13c   :  { %2278 = vst [vmem:[#allocation14_spill] sm:$0xff] %v1995_v55  ;;  %2279 = vst [vmem:[#allocation15_spill] sm:$0xff] %v1997_v58  ;;  %v929_v31 = vsel %vm928_vm0, %v927_v62, %v1991_v14  ;;  %v2016_v57 = vadd.f32 %v875_v39, %v1968_v45  ;;  %v936_v36 = vrot.slane %v1993_v56, 4  ;;  %v2020_v51 = vadd.f32 %v876_v38, %v860_v15 }
 0x13d   :  { %2280 = vst [vmem:[#allocation16_spill] sm:$0xff] %v1999_v40  ;;  %2281 = vst [vmem:[#allocation17_spill] sm:$0xff] %v2001_v48  ;;  %v932_v41 = vsel %vm931_vm1, %v930_v44, %v929_v31  ;;  %v939_v21 = vrot.slane %v1995_v55, 3  ;;  %v948_v23 = vrot.slane %v1999_v40, 7  ;;  %v2025_v3 = vadd.f32 %v877_v42, %v861_v18 }
 0x13e   :  { %2282 = vst [vmem:[#allocation18_spill] sm:$0xff] %v2003_v59  ;;  %2283 = vst [vmem:[#allocation19_spill] sm:$0xff] %v2008_v28  ;;  %v935_v37 = vsel %vm934_vm2, %v933_v11, %v932_v41  ;;  %v950_v45 = vrot.slane %v2001_v48, 6  ;;  %v952_v1 = vrot.slane %v2003_v59, 5  ;;  %v2030_v2 = vadd.f32 %v878_v60, %v862_v4 }
 0x13f   :  { %2284 = vst [vmem:[#allocation20_spill] sm:$0xff] %v2011_v9  ;;  %2285 = vst [vmem:[#allocation21_spill] sm:$0xff] %v2016_v57  ;;  %v938_v24 = vsel %vm937_vm3, %v936_v36, %v935_v37  ;;  %v949_v30 = vsel %vm928_vm0, %v948_v23, %v2011_v9  ;;  %v942_v0 = vrot.slane %v1997_v58, 2  ;;  %v954_v33 = vrot.slane %v2016_v57, 4 }
 0x140   :  { %2286 = vst [vmem:[#allocation22_spill] sm:$0xff] %v2020_v51  ;;  %2287 = vst [vmem:[#allocation23_spill] sm:$0xff] %v2025_v3  ;;  %v941_v17 = vsel %vm940_vm4, %v939_v21, %v938_v24  ;;  %v951_v12 = vsel %vm931_vm1, %v950_v45, %v949_v30  ;;  %v956_v22 = vrot.slane %v2020_v51, 3  ;;  %v958_v35 = vrot.slane %v2025_v3, 2 }
 0x141   :  { %2288 = vst [vmem:[#allocation24_spill] sm:$0xff] %v2030_v2  ;;  %v953_v7 = vsel %vm934_vm2, %v952_v1, %v951_v12  ;;  %v944_v63 = vsel %vm943_vm5, %v942_v0, %v941_v17  ;;  %v945_v25 = vrot.slane %v2008_v28, 1  ;;  %v960_v10 = vrot.slane %v2030_v2, 1 }
 0x142   :  { %v955_v49 = vsel %vm937_vm3, %v954_v33, %v953_v7 }
 0x143   :  { %v957_v6 = vsel %vm940_vm4, %v956_v22, %v955_v49  ;;  %v947_v13 = vsel %vm946_vm6, %v945_v25, %v944_v63 }
 0x144   :  { %v959_v20 = vsel %vm943_vm5, %v958_v35, %v957_v6 }
 0x145   :  { %v961_v16 = vsel %vm946_vm6, %v960_v10, %v959_v20 }
 0x146   :  { %v964_v43 = vadd.f32 %v961_v16, %v947_v13 }
 0x148   :  { %v965_v27 = vrot.slane %v964_v43, 4 }
 0x14a   :  { %v966_v8 = vadd.f32 %v965_v27, %v964_v43 }
 0x14c   :  { %v967_v46 = vrot.slane %v966_v8, 2 }
 0x14e   :  { %v968_v19 = vadd.f32 %v967_v46, %v966_v8 }
 0x150   :  { %v969_v61 = vrot.slane %v968_v19, 1 }
 0x152   :  { %v970_v5 = vadd.f32 %v969_v61, %v968_v19 }
 0x154   :  { %v971_v47 = vmul.f32 0.0625, %v970_v5 }
 0x156   :  { %v975_v29 = vrot.slane %v971_v47, %v2289_v52 }
 0x158   :  { %v2051_v32 = vsub.f32 %v1985_v53, %v975_v29  ;;  %v2054_v34 = vsub.f32 %v1987_v54, %v975_v29  ;;  %v2057_v50 = vsub.f32 %v1991_v14, %v975_v29  ;;  %v2060_v39 = vsub.f32 %v1989_v26, %v975_v29 }
 0x159   :  { %v2063_v38 = vsub.f32 %v1999_v40, %v975_v29  ;;  %v2066_v15 = vsub.f32 %v2001_v48, %v975_v29  ;;  %v2069_v42 = vsub.f32 %v1993_v56, %v975_v29  ;;  %v2072_v18 = vsub.f32 %v1995_v55, %v975_v29 }
 0x15a   :  { %v2075_v4 = vsub.f32 %v1997_v58, %v975_v29  ;;  %v2078_v60 = vsub.f32 %v2003_v59, %v975_v29  ;;  %v2081_v62 = vsub.f32 %v2008_v28, %v975_v29  ;;  %v2084_v44 = vsub.f32 %v2016_v57, %v975_v29 }
 0x15b   :  { %v993_v11 = vmul.f32 %v2051_v32, %v2051_v32  ;;  %v994_v31 = vmul.f32 %v2054_v34, %v2054_v34  ;;  %v2091_v41 = vsub.f32 %v2011_v9, %v975_v29  ;;  %v2094_v36 = vsub.f32 %v2020_v51, %v975_v29 }
 0x15c   :  { %v2097_v37 = vsub.f32 %v2025_v3, %v975_v29  ;;  %v2100_v21 = vsub.f32 %v2030_v2, %v975_v29  ;;  %v992_v23 = vmul.f32 %v2057_v50, %v2057_v50  ;;  %v995_v24 = vmul.f32 %v2060_v39, %v2060_v39 }
 0x15d   :  { %v1001_v45 = vmul.f32 %v2063_v38, %v2063_v38  ;;  %v1002_v1 = vmul.f32 %v2066_v15, %v2066_v15  ;;  %v996_v17 = vmul.f32 %v2069_v42, %v2069_v42  ;;  %v997_v30 = vmul.f32 %v2072_v18, %v2072_v18 }
 0x15e   :  { %v998_v0 = vmul.f32 %v2075_v4, %v2075_v4  ;;  %v1003_v12 = vmul.f32 %v2078_v60, %v2078_v60  ;;  %v999_v33 = vmul.f32 %v2081_v62, %v2081_v62  ;;  %v1004_v7 = vmul.f32 %v2084_v44, %v2084_v44 }
 0x15f   :  { %v1024_v22 = vrot.slane %v993_v11, 7  ;;  %v1026_v63 = vrot.slane %v994_v31, 6  ;;  %v1000_v49 = vmul.f32 %v2091_v41, %v2091_v41  ;;  %v1005_v35 = vmul.f32 %v2094_v36, %v2094_v36 }
 0x160   :  { %v1006_v25 = vmul.f32 %v2097_v37, %v2097_v37  ;;  %v1038_v6 = vrot.slane %v1001_v45, 7  ;;  %v1007_v10 = vmul.f32 %v2100_v21, %v2100_v21  ;;  %v1028_v13 = vrot.slane %v995_v24, 5 }
 0x161   :  { %v1025_v20 = vsel %vm928_vm0, %v1024_v22, %v992_v23  ;;  %v1040_v16 = vrot.slane %v1002_v1, 6  ;;  %v1030_v27 = vrot.slane %v996_v17, 4  ;;  %v1042_v46 = vrot.slane %v1003_v12, 5 }
 0x162   :  { %v1027_v43 = vsel %vm931_vm1, %v1026_v63, %v1025_v20  ;;  %v1039_v8 = vsel %vm928_vm0, %v1038_v6, %v1000_v49  ;;  %v1032_v61 = vrot.slane %v997_v30, 3  ;;  %v1044_v47 = vrot.slane %v1004_v7, 4 }
 0x163   :  { %v1029_v19 = vsel %vm934_vm2, %v1028_v13, %v1027_v43  ;;  %v1041_v5 = vsel %vm931_vm1, %v1040_v16, %v1039_v8  ;;  %v1034_v11 = vrot.slane %v998_v0, 2  ;;  %v1046_v23 = vrot.slane %v1005_v35, 3  ;;  %v1087_v8 = vpop.permute.xlu0 %1086 }
 0x164   :  { %v1031_v29 = vsel %vm937_vm3, %v1030_v27, %v1029_v19  ;;  %v1043_v31 = vsel %vm934_vm2, %v1042_v46, %v1041_v5  ;;  %v1036_v45 = vrot.slane %v999_v33, 1  ;;  %v1048_v17 = vrot.slane %v1006_v25, 2  ;;  %v2144_v27 = vpop.permute.xlu1 %1090 }
 0x165   :  { %v1033_v24 = vsel %vm940_vm4, %v1032_v61, %v1031_v29  ;;  %v1045_v1 = vsel %vm937_vm3, %v1044_v47, %v1043_v31  ;;  %v1050_v30 = vrot.slane %v1007_v10, 1  ;;  %v1099_v46 = vrot.slane %v2144_v27, 1 }
 0x166   :  { %v1035_v12 = vsel %vm943_vm5, %v1034_v11, %v1033_v24  ;;  %v1047_v22 = vsel %vm940_vm4, %v1046_v23, %v1045_v1  ;;  %v1100_v19 = vrot.slane %v2144_v27, 2  ;;  %v1101_v61 = vrot.slane %v2144_v27, 3 }
 0x167   :  { %v1037_v63 = vsel %vm946_vm6, %v1036_v45, %v1035_v12  ;;  %v1049_v7 = vsel %vm943_vm5, %v1048_v17, %v1047_v22  ;;  %v1102_v5 = vrot.slane %v2144_v27, 4  ;;  %v1103_v47 = vrot.slane %v2144_v27, 5  ;;  %v2153_v31 = vpop.permute.xlu0 %1140 }
 0x168   :  { %v1051_v0 = vsel %vm946_vm6, %v1050_v30, %v1049_v7  ;;  %v2146_v10 = vpop.permute.xlu1 %1144  ;;  %v1092_v29 = vrot.slane %v1087_v8, 1  ;;  %v1093_v11 = vrot.slane %v1087_v8, 2  ;;  %v1094_v23 = vrot.slane %v1087_v8, 3 }
 0x169   :  { %v1054_v49 = vadd.f32 %v1051_v0, %v1037_v63  ;;  %2290 = vst [vmem:[#allocation8_spill] sm:$0xff] %v2146_v10  ;;  %v1095_v24 = vrot.slane %v1087_v8, 4  ;;  %v1096_v45 = vrot.slane %v1087_v8, 5  ;;  %v1153_v1 = vrot.slane %v2146_v10, 1 }
 0x16a   :  { %v1154_v12 = vrot.slane %v2146_v10, 2  ;;  %v1155_v22 = vrot.slane %v2146_v10, 3  ;;  %v1156_v30 = vrot.slane %v2146_v10, 4  ;;  %v1157_v63 = vrot.slane %v2146_v10, 5 }
 0x16b   :  { %v1055_v6 = vrot.slane %v1054_v49, 4  ;;  %v1158_v7 = vrot.slane %v2146_v10, 6  ;;  %v1146_v0 = vrot.slane %v2153_v31, 1  ;;  %v1098_v2 = vrot.slane %v1087_v8, 7 }
 0x16c   :  { %v1104_v3 = vrot.slane %v2144_v27, 6  ;;  %v1105_v51 = vrot.slane %v2144_v27, 7 }
 0x16d   :  { %v1056_v35 = vadd.f32 %v1055_v6, %v1054_v49  ;;  %v1147_v49 = vrot.slane %v2153_v31, 2 }
 0x16f   :  { %v1057_v20 = vrot.slane %v1056_v35, 2 }
 0x171   :  { %v1058_v13 = vadd.f32 %v1057_v20, %v1056_v35  ;;  %v1148_v35 = vrot.slane %v2153_v31, 3  ;;  %v1149_v20 = vrot.slane %v2153_v31, 4 }
 0x173   :  { %v1059_v33 = vrot.slane %v1058_v13, 1 }
 0x175   :  { %v1060_v16 = vadd.f32 %v1059_v33, %v1058_v13  ;;  %v1150_v13 = vrot.slane %v2153_v31, 5  ;;  %v1151_v33 = vrot.slane %v2153_v31, 6 }
 0x177   :  { %v1061_v43 = vmul.f32 0.0625, %v1060_v16 }
 0x179   :  { %v1062_v25 = vadd.f32 1e-05, %v1061_v43 }
 0x17b   :  { %1402 = vrsqrt.f32 %v1062_v25  ;;  %v1097_v25 = vrot.slane %v1087_v8, 6 }
 0x185   :  { %v1403_v17 = vpop.eup %1402 }
 0x186   :  { %v1067_v6 = vrot.slane %v1403_v17, %v2289_v52  ;;  %v1152_v52 = vrot.slane %v2153_v31, 7  ;;  %v1159_v17 = vrot.slane %v2146_v10, 7 }
 0x188   :  { %v1069_v16 = vmul.f32 %v1067_v6, %v2051_v32  ;;  %v1070_v43 = vmul.f32 %v1067_v6, %v2054_v34  ;;  %v1068_v9 = vmul.f32 %v1067_v6, %v2057_v50  ;;  %v1071_v57 = vmul.f32 %v1067_v6, %v2060_v39 }
 0x189   :  { %v1077_v28 = vmul.f32 %v1067_v6, %v2063_v38  ;;  %v1078_v32 = vmul.f32 %v1067_v6, %v2066_v15  ;;  %v1072_v34 = vmul.f32 %v1067_v6, %v2069_v42  ;;  %v1073_v59 = vmul.f32 %v1067_v6, %v2072_v18 }
 0x18a   :  { %v1074_v58 = vmul.f32 %v1067_v6, %v2075_v4  ;;  %v1079_v55 = vmul.f32 %v1067_v6, %v2078_v60  ;;  %v1075_v56 = vmul.f32 %v1067_v6, %v2081_v62  ;;  %v1080_v48 = vmul.f32 %v1067_v6, %v2084_v44 }
 0x18b   :  { %v1123_v40 = vmul.f32 %v1092_v29, %v1069_v16  ;;  %v1124_v50 = vmul.f32 %v1093_v11, %v1070_v43  ;;  %v1076_v39 = vmul.f32 %v1067_v6, %v2091_v41  ;;  %v1081_v38 = vmul.f32 %v1067_v6, %v2094_v36 }
 0x18c   :  { %v1082_v15 = vmul.f32 %v1067_v6, %v2097_v37  ;;  %v1083_v42 = vmul.f32 %v1067_v6, %v2100_v21  ;;  %v1122_v26 = vmul.f32 %v1087_v8, %v1068_v9  ;;  %v1125_v18 = vmul.f32 %v1094_v23, %v1071_v57  ;;  %v2297_v23 = vld [vmem:[#allocation17_spill] sm:$0xff] }
 0x18d   :  { %v1131_v14 = vmul.f32 %v1099_v46, %v1077_v28  ;;  %v1132_v4 = vmul.f32 %v1100_v19, %v1078_v32  ;;  %v1126_v10 = vmul.f32 %v1095_v24, %v1072_v34  ;;  %v1127_v60 = vmul.f32 %v1096_v45, %v1073_v59  ;;  %v2293_v19 = vld [vmem:[#allocation8_spill] sm:$0xff]  ;;  %v2298_v24 = vld [vmem:[#allocation13_spill] sm:$0xff]  ;;  %v2299_v45 = vld [vmem:[#allocation14_spill] sm:$0xff] }
 0x18e   :  { %v1128_v54 = vmul.f32 %v1097_v25, %v1074_v58  ;;  %v1133_v62 = vmul.f32 %v1101_v61, %v1079_v55  ;;  %v1129_v53 = vmul.f32 %v1098_v2, %v1075_v56  ;;  %v1134_v44 = vmul.f32 %v1102_v5, %v1080_v48  ;;  %v2291_v56 = vld [vmem:[#allocation11_spill] sm:$0xff]  ;;  %v2294_v5 = vld [vmem:[#allocation12_spill] sm:$0xff]  ;;  %v2305_v25 = vld [vmem:[#allocation22_spill] sm:$0xff] }
 0x18f   :  { %v1177_v29 = vadd.f32 %v1146_v0, %v1123_v40  ;;  %v1178_v11 = vadd.f32 %v1147_v49, %v1124_v50  ;;  %v1130_v41 = vmul.f32 %v2144_v27, %v1076_v39  ;;  %v1135_v16 = vmul.f32 %v1103_v47, %v1081_v38  ;;  %v2292_v40 = vld [vmem:[#allocation9_spill] sm:$0xff]  ;;  %v2295_v47 = vld [vmem:[#allocation10_spill] sm:$0xff]  ;;  %v2302_v49 = vld [vmem:[#allocation19_spill] sm:$0xff] }
 0x190   :  { %v1136_v36 = vmul.f32 %v1104_v3, %v1082_v15  ;;  %v1137_v43 = vmul.f32 %v1105_v51, %v1083_v42  ;;  %v1176_v37 = vadd.f32 %v2153_v31, %v1122_v26  ;;  %v1179_v21 = vadd.f32 %v1148_v35, %v1125_v18  ;;  %v2296_v31 = vld [vmem:[#allocation16_spill] sm:$0xff] }
 0x191   :  { %v1185_v9 = vadd.f32 %v1153_v1, %v1131_v14  ;;  %v1186_v57 = vadd.f32 %v1154_v12, %v1132_v4  ;;  %v1180_v28 = vadd.f32 %v1149_v20, %v1126_v10  ;;  %v1181_v8 = vadd.f32 %v1150_v13, %v1127_v60  ;;  %v2300_v12 = vld [vmem:[#allocation15_spill] sm:$0xff]  ;;  %v2304_v13 = vld [vmem:[#allocation20_spill] sm:$0xff] }
 0x192   :  { %v1182_v46 = vadd.f32 %v1151_v33, %v1128_v54  ;;  %v1187_v59 = vadd.f32 %v1155_v22, %v1133_v62  ;;  %v1183_v58 = vadd.f32 %v1152_v52, %v1129_v53  ;;  %v1188_v55 = vadd.f32 %v1156_v30, %v1134_v44  ;;  %v2301_v30 = vld [vmem:[#allocation18_spill] sm:$0xff]  ;;  %v2307_v34 = vld [vmem:[#allocation24_spill] sm:$0xff] }
 0x193   :  { %v1193_v48 = vadd.f32 %v1177_v29, %v2291_v56  ;;  %v1194_v2 = vadd.f32 %v1178_v11, %v2292_v40  ;;  %v1184_v27 = vadd.f32 %v2293_v19, %v1130_v41  ;;  %v1189_v61 = vadd.f32 %v1157_v63, %v1135_v16 }
 0x194   :  { %v1190_v3 = vadd.f32 %v1158_v7, %v1136_v36  ;;  %v1191_v51 = vadd.f32 %v1159_v17, %v1137_v43  ;;  %v1192_v26 = vadd.f32 %v1176_v37, %v2294_v5  ;;  %v1195_v14 = vadd.f32 %v1179_v21, %v2295_v47  ;;  %v2303_v7 = vld [vmem:[#allocation21_spill] sm:$0xff]  ;;  %v2306_v17 = vld [vmem:[#allocation23_spill] sm:$0xff] }
 0x195   :  { %v1201_v10 = vadd.f32 %v1185_v9, %v2296_v31  ;;  %v1202_v54 = vadd.f32 %v1186_v57, %v2297_v23  ;;  %v1196_v53 = vadd.f32 %v1180_v28, %v2298_v24  ;;  %v1197_v1 = vadd.f32 %v1181_v8, %v2299_v45 }
 0x196   :  { %v1198_v22 = vadd.f32 %v1182_v46, %v2300_v12  ;;  %v1203_v0 = vadd.f32 %v1187_v59, %v2301_v30  ;;  %v1199_v63 = vadd.f32 %v1183_v58, %v2302_v49  ;;  %v1204_v6 = vadd.f32 %v1188_v55, %v2303_v7 }
 0x197   :  { %v1209_v35 = vmax.f32 %v1193_v48, 0.0  ;;  %v1210_v20 = vmax.f32 %v1194_v2, 0.0  ;;  %v1200_v33 = vadd.f32 %v1184_v27, %v2304_v13  ;;  %v1205_v52 = vadd.f32 %v1189_v61, %v2305_v25 }
 0x198   :  { %v1206_v32 = vadd.f32 %v1190_v3, %v2306_v17  ;;  %v1207_v50 = vadd.f32 %v1191_v51, %v2307_v34  ;;  %v1208_v39 = vmax.f32 %v1192_v26, 0.0  ;;  %v1211_v38 = vmax.f32 %v1195_v14, 0.0 }
 0x199   :  { %v1217_v15 = vmax.f32 %v1201_v10, 0.0  ;;  %v1218_v42 = vmax.f32 %v1202_v54, 0.0  ;;  %v1212_v18 = vmax.f32 %v1196_v53, 0.0  ;;  %v1213_v4 = vmax.f32 %v1197_v1, 0.0 }
 0x19a   :  { %v1214_v60 = vmax.f32 %v1198_v22, 0.0  ;;  %v1219_v62 = vmax.f32 %v1203_v0, 0.0  ;;  %v1215_v44 = vmax.f32 %v1199_v63, 0.0  ;;  %v1220_v29 = vmax.f32 %v1204_v6, 0.0 }
 0x19b   :  { %v1240_v11 = vrot.slane %v1209_v35, 7  ;;  %v1242_v41 = vrot.slane %v1210_v20, 6  ;;  %v1216_v16 = vmax.f32 %v1200_v33, 0.0  ;;  %v1221_v36 = vmax.f32 %v1205_v52, 0.0 }
 0x19c   :  { %v1222_v43 = vmax.f32 %v1206_v32, 0.0  ;;  %v1254_v37 = vrot.slane %v1217_v15, 7  ;;  %v1223_v21 = vmax.f32 %v1207_v50, 0.0  ;;  %v1244_v57 = vrot.slane %v1211_v38, 5 }
 0x19d   :  { %v1241_v9 = vsel %vm928_vm0, %v1240_v11, %v1208_v39  ;;  %v1256_v28 = vrot.slane %v1218_v42, 6  ;;  %v1246_v46 = vrot.slane %v1212_v18, 4  ;;  %v1258_v58 = vrot.slane %v1219_v62, 5 }
 0x19e   :  { %v1243_v8 = vsel %vm931_vm1, %v1242_v41, %v1241_v9  ;;  %v1255_v59 = vsel %vm928_vm0, %v1254_v37, %v1216_v16  ;;  %v1248_v56 = vrot.slane %v1213_v4, 3  ;;  %v1260_v40 = vrot.slane %v1220_v29, 4 }
 0x19f   :  { %v1245_v55 = vsel %vm934_vm2, %v1244_v57, %v1243_v8  ;;  %v1257_v48 = vsel %vm931_vm1, %v1256_v28, %v1255_v59  ;;  %v1250_v19 = vrot.slane %v1214_v60, 2  ;;  %v1262_v61 = vrot.slane %v1221_v36, 3 }
 0x1a0   :  { %v1247_v2 = vsel %vm937_vm3, %v1246_v46, %v1245_v55  ;;  %v1259_v27 = vsel %vm934_vm2, %v1258_v58, %v1257_v48  ;;  %v1252_v51 = vrot.slane %v1215_v44, 1  ;;  %v1264_v26 = vrot.slane %v1222_v43, 2 }
 0x1a1   :  { %v1249_v3 = vsel %vm940_vm4, %v1248_v56, %v1247_v2  ;;  %v1261_v5 = vsel %vm937_vm3, %v1260_v40, %v1259_v27  ;;  %v1266_v31 = vrot.slane %v1223_v21, 1 }
 0x1a2   :  { %v1251_v47 = vsel %vm943_vm5, %v1250_v19, %v1249_v3  ;;  %v1263_v14 = vsel %vm940_vm4, %v1262_v61, %v1261_v5 }
 0x1a3   :  { %v1253_v10 = vsel %vm946_vm6, %v1252_v51, %v1251_v47  ;;  %v1265_v23 = vsel %vm943_vm5, %v1264_v26, %v1263_v14 }
 0x1a4   :  { %v1267_v54 = vsel %vm946_vm6, %v1266_v31, %v1265_v23  ;;  %1270 = vst [vmem:[#allocation5] sm:$0xff] %v1253_v10 }
 0x1a5   :  { %1271 = vst [vmem:[#allocation5 + $0x8] sm:$0xff] %v1267_v54 }
 0x1a6   :  { %1429 = shalt.err (!%p1426_p9)
}
 0x1a7   :  { %s1430_s8 = scalar_lea.hbm %s2239_s6, 256 }
 0x1a8   :  { %p1431_p10 = scmp.ne.s32.totalorder %s2239_s6, %s1430_s8  ;;  %p1434_p11 = scmp.lt.u32.totalorder %s1430_s8, %s2239_s6 }
 0x1aa   :  { %p1436_p12 = pnand %p1434_p11, %p1431_p10 }
 0x1ac   :  { %1439 = shalt.err (!%p1436_p12)
}
 0x1ad   :  { %s1448_s13 = smov 128   ;;  %s1449_s14 = smov 8  }
 0x1ae   :  { %1283 = dma.vmem_to_hbm [thread:$0]  %s1278_s29, 256, %s2239_s6, [#allocation3], %s1448_s13, %s1448_s13, %s1449_s14  }
 0x1af   :  { %1442 = dma.done.wait [#allocation3], 256  }
 0x1b0   :  { %1443 = vsyncadd [#allocation3], 4294967040 }
 0x1b1   :  { %1287 = vsyncpa [#allocation3], 1 }
 0x1b2   :  { %1288 = vsyncpa [#allocation4], 1 }

</bundles_post_ra>
